<compile_context>
chip_gen: v7x
topology: tpu7x:2x2x1
jax: 0.10.0
libtpu: 0.0.40
codegen_flags: <defaults>
</compile_context>

<pallas_src>
import functools

import jax
import jax.numpy as jnp
from jax import lax
from jax.experimental import pallas as pl
from jax.experimental.pallas import tpu as pltpu


def _round_up(x, m):
    return (x + m - 1) // m * m


# ----------------------------------------------------------------------------
# Pallas kernel: LSTM recurrence for one layer, grid over time CHUNKS.
# Inputs:
#   gates_ref : (T_BLK, Bp, 4*Hp)  precomputed x@W_ih^T + bias (padded)
#   whh_ref   : (Hp, 4*Hp)         recurrent weights (resident across grid)
# Outputs:
#   out_ref   : (T_BLK, Bp, Hp)    hidden state per timestep
#   hN_ref    : (Bp, Hp)           final hidden state
#   cN_ref    : (Bp, Hp)           final cell state
# Scratch: h_sc, c_sc carry the state across grid steps.
# ----------------------------------------------------------------------------
def _lstm_chunk_kernel(gates_ref, whh_ref, out_ref, hN_ref, cN_ref,
                       h_sc, c_sc, *, hp, t_blk, seq_len, need_mask, unroll):
    chunk = pl.program_id(0)

    @pl.when(chunk == 0)
    def _():
        h_sc[...] = jnp.zeros_like(h_sc)
        c_sc[...] = jnp.zeros_like(c_sc)

    def step(i, carry):
        h, c = carry
        # (Bp, 4*Hp): hoisted input projection + recurrent projection
        gates = gates_ref[i] + jnp.dot(h, whh_ref[...],
                                       preferred_element_type=jnp.float32)
        i_g = jax.nn.sigmoid(gates[:, 0 * hp:1 * hp])   # input gate
        f_g = jax.nn.sigmoid(gates[:, 1 * hp:2 * hp])   # forget gate
        g_g = jnp.tanh(gates[:, 2 * hp:3 * hp])         # cell candidate
        o_g = jax.nn.sigmoid(gates[:, 3 * hp:4 * hp])   # output gate

        c_new = f_g * c + i_g * g_g
        h_new = o_g * jnp.tanh(c_new)

        if need_mask:  # freeze state on padded tail timesteps
            valid = (chunk * t_blk + i) < seq_len
            h_new = jnp.where(valid, h_new, h)
            c_new = jnp.where(valid, c_new, c)

        out_ref[i] = h_new                              # lane-dense (Bp, Hp)
        return (h_new, c_new)

    h_f, c_f = lax.fori_loop(0, t_blk, step, (h_sc[...], c_sc[...]),
                             unroll=unroll)
    h_sc[...] = h_f
    c_sc[...] = c_f

    @pl.when(chunk == pl.num_programs(0) - 1)
    def _():
        hN_ref[...] = h_f
        cN_ref[...] = c_f


# ----------------------------------------------------------------------------
# One LSTM layer over a full sequence.
#   x:      (S, B, E) fp32
#   w_ih_t: (E, 4H)   fp32  (pre-transposed W_ih)
#   w_hh_t: (H, 4H)   fp32  (pre-transposed W_hh)
#   bias:   (1, 4H)   fp32  (b_ih + b_hh)
# returns (outputs (S,B,H), h_n (B,H), c_n (B,H))
# ----------------------------------------------------------------------------
def lstm_layer(x, w_ih_t, w_hh_t, bias, *, t_blk=None):
    S, B, E = x.shape
    H = w_hh_t.shape[0]

    # ---- hoisted input projection: one big MXU-friendly GEMM, bias folded ----
    gates_in = (jnp.dot(x.reshape(S * B, E), w_ih_t,
                        preferred_element_type=jnp.float32) + bias)
    gates_in = gates_in.reshape(S, B, 4, H)

    # ---- pad to (8, 128)-aligned tiles: B -> sublane mult, per-gate H -> lane mult
    Bp = _round_up(max(B, 8), 8)
    Hp = _round_up(max(H, 128), 128)
    gates_in = jnp.pad(gates_in, ((0, 0), (0, Bp - B), (0, 0), (0, Hp - H)))
    gates_in = gates_in.reshape(S, Bp, 4 * Hp)

    whh = jnp.pad(w_hh_t.reshape(H, 4, H),
                  ((0, Hp - H), (0, 0), (0, Hp - H))).reshape(Hp, 4 * Hp)

    # ---- chunk the time axis (amortize per-grid-step pipeline overhead) ----
    if t_blk is None:
        bytes_per_step = Bp * 4 * Hp * 4
        t_blk = max(1, min(S, 64, (2 << 20) // bytes_per_step))
    Sp = _round_up(S, t_blk)
    if Sp != S:
        gates_in = jnp.pad(gates_in, ((0, Sp - S), (0, 0), (0, 0)))
    n_chunks = Sp // t_blk
    unroll = True if t_blk <= 16 else 8

    kernel = functools.partial(_lstm_chunk_kernel, hp=Hp, t_blk=t_blk,
                               seq_len=S, need_mask=(Sp != S), unroll=unroll)

    outs, h_n, c_n = pl.pallas_call(
        kernel,
        out_shape=(jax.ShapeDtypeStruct((Sp, Bp, Hp), jnp.float32),
                   jax.ShapeDtypeStruct((Bp, Hp), jnp.float32),
                   jax.ShapeDtypeStruct((Bp, Hp), jnp.float32)),
        grid_spec=pltpu.PrefetchScalarGridSpec(
            num_scalar_prefetch=0,
            grid=(n_chunks,),
            in_specs=[
                pl.BlockSpec((t_blk, Bp, 4 * Hp), lambda c: (c, 0, 0)),  # gates_in
                pl.BlockSpec((Hp, 4 * Hp), lambda c: (0, 0)),            # W_hh (resident)
            ],
            out_specs=[
                pl.BlockSpec((t_blk, Bp, Hp), lambda c: (c, 0, 0)),      # outputs
                pl.BlockSpec((Bp, Hp), lambda c: (0, 0)),                # h_n
                pl.BlockSpec((Bp, Hp), lambda c: (0, 0)),                # c_n
            ],
            scratch_shapes=[pltpu.VMEM((Bp, Hp), jnp.float32),           # h carry
                            pltpu.VMEM((Bp, Hp), jnp.float32)],          # c carry
        ),
        compiler_params=pltpu.CompilerParams(
            dimension_semantics=("arbitrary",)),   # sequential recurrence
    )(gates_in, whh)

    return outs[:S, :B, :H], h_n[:B, :H], c_n[:B, :H]


# ----------------------------------------------------------------------------
# Encoder forward (glue in plain JAX, LSTM recurrence in Pallas)
# ----------------------------------------------------------------------------
def encoder_forward(X, params):
    """X: (S, B) int32 token indices. Returns (outputs, hidden, cell)."""
    embedded = params["embedding"][X]            # (S, B, E) gather (glue)
    # TODO(synk): training-mode dropout with PRNG mask not implemented (inference identity).
    x = embedded

    hiddens, cells = [], []
    for layer in params["lstm"]:
        outputs, h_n, c_n = lstm_layer(x, layer["w_ih_t"], layer["w_hh_t"],
                                       layer["bias"])
        hiddens.append(h_n)
        cells.append(c_n)
        x = outputs
    hidden = jnp.stack(hiddens, axis=0)          # (n_layers, B, H)
    cell = jnp.stack(cells, axis=0)              # (n_layers, B, H)
    return x, hidden, cell


# ----------------------------------------------------------------------------
# Deterministic parameter init (PyTorch-like shapes)
# ----------------------------------------------------------------------------
def init_params(key, input_dim, embed_dim, hidden_dim, n_layers):
    keys = jax.random.split(key, 1 + 4 * n_layers)
    emb = jax.random.normal(keys[0], (input_dim, embed_dim), jnp.float32)
    scale = 1.0 / jnp.sqrt(hidden_dim)
    layers = []
    for l in range(n_layers):
        in_dim = embed_dim if l == 0 else hidden_dim
        k_wih, k_whh, k_bih, k_bhh = keys[1 + 4 * l: 5 + 4 * l]
        w_ih = jax.random.uniform(k_wih, (4 * hidden_dim, in_dim), jnp.float32,
                                  -scale, scale)
        w_hh = jax.random.uniform(k_whh, (4 * hidden_dim, hidden_dim),
                                  jnp.float32, -scale, scale)
        b_ih = jax.random.uniform(k_bih, (4 * hidden_dim,), jnp.float32,
                                  -scale, scale)
        b_hh = jax.random.uniform(k_bhh, (4 * hidden_dim,), jnp.float32,
                                  -scale, scale)
        layers.append({
            "w_ih_t": w_ih.T,                              # (in_dim, 4H)
            "w_hh_t": w_hh.T,                              # (H, 4H)
            "bias": (b_ih + b_hh).reshape(1, 4 * hidden_dim),
        })
    return {"embedding": emb, "lstm": layers}


# ----------------------------------------------------------------------------
# Pure-JAX reference (lax.scan) for a correctness sanity check
# ----------------------------------------------------------------------------
def _ref_lstm_layer(x, w_ih_t, w_hh_t, bias):
    S, B, _ = x.shape
    H = w_hh_t.shape[0]

    def step(carry, x_t):
        h, c = carry
        gates = x_t @ w_ih_t + h @ w_hh_t + bias
        i = jax.nn.sigmoid(gates[:, 0:H])
        f = jax.nn.sigmoid(gates[:, H:2 * H])
        g = jnp.tanh(gates[:, 2 * H:3 * H])
        o = jax.nn.sigmoid(gates[:, 3 * H:4 * H])
        c = f * c + i * g
        h = o * jnp.tanh(c)
        return (h, c), h

    h0 = jnp.zeros((B, H), jnp.float32)
    c0 = jnp.zeros((B, H), jnp.float32)
    (h_n, c_n), outs = jax.lax.scan(step, (h0, c0), x)
    return outs, h_n, c_n


def _ref_encoder(X, params):
    x = params["embedding"][X]
    hs, cs = [], []
    for layer in params["lstm"]:
        x, h, c = _ref_lstm_layer(x, layer["w_ih_t"], layer["w_hh_t"],
                                  layer["bias"])
        hs.append(h)
        cs.append(c)
    return x, jnp.stack(hs, 0), jnp.stack(cs, 0)


# ----------------------------------------------------------------------------
if __name__ == "__main__":
    input_dim = 16     # vocab size
    embed_dim = 32
    hidden_dim = 32
    n_layers = 2
    seq_len = 8
    batch = 2

    key = jax.random.PRNGKey(0)
    k_param, k_data = jax.random.split(key)
    params = init_params(k_param, input_dim, embed_dim, hidden_dim, n_layers)
    X = jax.random.randint(k_data, (seq_len, batch), 0, input_dim, jnp.int32)

    outputs, hidden, cell = encoder_forward(X, params)
    jax.block_until_ready((outputs, hidden, cell))

    # sanity check vs pure-JAX reference
    ref_out, ref_h, ref_c = _ref_encoder(X, params)
    assert outputs.shape == (seq_len, batch, hidden_dim)
    assert hidden.shape == (n_layers, batch, hidden_dim)
    assert cell.shape == (n_layers, batch, hidden_dim)
    assert jnp.allclose(outputs, ref_out, atol=1e-5, rtol=1e-5)
    assert jnp.allclose(hidden, ref_h, atol=1e-5, rtol=1e-5)
    assert jnp.allclose(cell, ref_c, atol=1e-5, rtol=1e-5)

    print("KERNEL_OK")
</pallas_src>

<mosaic_0001>
module attributes {stable_mosaic.version = 11 : i64} {
  func.func @_lstm_chunk_kernel(%arg0: i32, %arg1: memref<8x8x512xf32, #tpu.memory_space<vmem>>, %arg2: memref<128x512xf32, #tpu.memory_space<vmem>>, %arg3: memref<8x8x128xf32, #tpu.memory_space<vmem>>, %arg4: memref<8x128xf32, #tpu.memory_space<vmem>>, %arg5: memref<8x128xf32, #tpu.memory_space<vmem>>, %arg6: memref<8x128xf32, #tpu.memory_space<vmem>>, %arg7: memref<8x128xf32, #tpu.memory_space<vmem>>) attributes {dimension_semantics = [#tpu.dimension_semantics<arbitrary>], iteration_bounds = array<i64: 1>, scalar_prefetch = 0 : i64, scratch_operands = 2 : i64, tpu.core_type = #tpu.core_type<tc>, window_params = [{transform_indices = @transform_0, window_bounds = array<i64: 8, 8, 512>}, {pipeline_mode = #tpu.pipeline_mode<synchronous>, transform_indices = @transform_1, window_bounds = array<i64: 128, 512>}, {transform_indices = @transform_2, window_bounds = array<i64: 8, 8, 128>}, {pipeline_mode = #tpu.pipeline_mode<synchronous>, transform_indices = @transform_3, window_bounds = array<i64: 8, 128>}, {pipeline_mode = #tpu.pipeline_mode<synchronous>, transform_indices = @transform_4, window_bounds = array<i64: 8, 128>}]} {
    %c0_i32 = arith.constant 0 : i32
    %0 = arith.cmpi eq, %arg0, %c0_i32 : i32
    %1 = arith.extui %0 : i1 to i32
    %c0_i32_0 = arith.constant 0 : i32
    %2 = arith.cmpi ne, %1, %c0_i32_0 : i32
    scf.if %2 {
      %cst_90 = arith.constant 0.000000e+00 : f32
      %290 = vector.broadcast %cst_90 : f32 to vector<8x128xf32>
      %c0_91 = arith.constant 0 : index
      %c0_92 = arith.constant 0 : index
      %291 = vector.load %arg6[%c0_91, %c0_92] : memref<8x128xf32, #tpu.memory_space<vmem>>, vector<8x128xf32>
      tpu.vector_store %arg6[%c0_91, %c0_92], %290 {strides = array<i32>} : memref<8x128xf32, #tpu.memory_space<vmem>>, vector<8x128xf32>,
      %cst_93 = arith.constant 0.000000e+00 : f32
      %292 = vector.broadcast %cst_93 : f32 to vector<8x128xf32>
      %c0_94 = arith.constant 0 : index
      %c0_95 = arith.constant 0 : index
      %293 = vector.load %arg7[%c0_94, %c0_95] : memref<8x128xf32, #tpu.memory_space<vmem>>, vector<8x128xf32>
      tpu.vector_store %arg7[%c0_94, %c0_95], %292 {strides = array<i32>} : memref<8x128xf32, #tpu.memory_space<vmem>>, vector<8x128xf32>,
    } else {
    }
    %c0 = arith.constant 0 : index
    %c0_1 = arith.constant 0 : index
    %3 = vector.load %arg6[%c0, %c0_1] : memref<8x128xf32, #tpu.memory_space<vmem>>, vector<8x128xf32>
    %c0_2 = arith.constant 0 : index
    %c0_3 = arith.constant 0 : index
    %4 = vector.load %arg7[%c0_2, %c0_3] : memref<8x128xf32, #tpu.memory_space<vmem>>, vector<8x128xf32>
    %c0_i32_4 = arith.constant 0 : i32
    %5 = arith.index_cast %c0_i32_4 : i32 to index
    %c0_5 = arith.constant 0 : index
    %c0_6 = arith.constant 0 : index
    %6 = vector.load %arg1[%5, %c0_5, %c0_6] : memref<8x8x512xf32, #tpu.memory_space<vmem>>, vector<1x8x512xf32>
    %7 = vector.shape_cast %6 : vector<1x8x512xf32> to vector<8x512xf32>
    %c0_7 = arith.constant 0 : index
    %c0_8 = arith.constant 0 : index
    %8 = vector.load %arg2[%c0_7, %c0_8] : memref<128x512xf32, #tpu.memory_space<vmem>>, vector<128x512xf32>
    %cst = arith.constant dense<0.000000e+00> : vector<8x512xf32>
    %9 = tpu.matmul %3, %8, %cst {dimension_numbers = #tpu.dot_dimension_numbers<[1], [0], [0], [1], [0, 0, 1, 1], [], []>} : vector<8x128xf32>, vector<128x512xf32>, vector<8x512xf32> -> vector<8x512xf32>
    %10 = arith.addf %7, %9 : vector<8x512xf32>
    %11 = vector.extract_strided_slice %10 {offsets = [0, 0], sizes = [8, 128], strides = [1, 1]} : vector<8x512xf32> to vector<8x128xf32>
    %12 = arith.negf %11 : vector<8x128xf32>
    %13 = math.exp %12 : vector<8x128xf32>
    %cst_9 = arith.constant 1.000000e+00 : f32
    %14 = vector.broadcast %cst_9 : f32 to vector<8x128xf32>
    %15 = arith.addf %14, %13 : vector<8x128xf32>
    %16 = arith.divf %14, %15 : vector<8x128xf32>
    %17 = vector.extract_strided_slice %10 {offsets = [0, 128], sizes = [8, 128], strides = [1, 1]} : vector<8x512xf32> to vector<8x128xf32>
    %18 = arith.negf %17 : vector<8x128xf32>
    %19 = math.exp %18 : vector<8x128xf32>
    %cst_10 = arith.constant 1.000000e+00 : f32
    %20 = vector.broadcast %cst_10 : f32 to vector<8x128xf32>
    %21 = arith.addf %20, %19 : vector<8x128xf32>
    %22 = arith.divf %20, %21 : vector<8x128xf32>
    %23 = vector.extract_strided_slice %10 {offsets = [0, 256], sizes = [8, 128], strides = [1, 1]} : vector<8x512xf32> to vector<8x128xf32>
    %24 = math.tanh %23 : vector<8x128xf32>
    %25 = vector.extract_strided_slice %10 {offsets = [0, 384], sizes = [8, 128], strides = [1, 1]} : vector<8x512xf32> to vector<8x128xf32>
    %26 = arith.negf %25 : vector<8x128xf32>
    %27 = math.exp %26 : vector<8x128xf32>
    %cst_11 = arith.constant 1.000000e+00 : f32
    %28 = vector.broadcast %cst_11 : f32 to vector<8x128xf32>
    %29 = arith.addf %28, %27 : vector<8x128xf32>
    %30 = arith.divf %28, %29 : vector<8x128xf32>
    %31 = arith.mulf %22, %4 : vector<8x128xf32>
    %32 = arith.mulf %16, %24 : vector<8x128xf32>
    %33 = arith.addf %31, %32 : vector<8x128xf32>
    %34 = math.tanh %33 : vector<8x128xf32>
    %35 = arith.mulf %30, %34 : vector<8x128xf32>
    %36 = arith.index_cast %c0_i32_4 : i32 to index
    %c0_12 = arith.constant 0 : index
    %c0_13 = arith.constant 0 : index
    %37 = vector.load %arg3[%36, %c0_12, %c0_13] : memref<8x8x128xf32, #tpu.memory_space<vmem>>, vector<1x8x128xf32>
    %38 = vector.shape_cast %37 : vector<1x8x128xf32> to vector<8x128xf32>
    %39 = vector.shape_cast %35 : vector<8x128xf32> to vector<1x8x128xf32>
    tpu.vector_store %arg3[%36, %c0_12, %c0_13], %39 {strides = array<i32>} : memref<8x8x128xf32, #tpu.memory_space<vmem>>, vector<1x8x128xf32>,
    %c1_i32 = arith.constant 1 : i32
    %40 = arith.index_cast %c1_i32 : i32 to index
    %c0_14 = arith.constant 0 : index
    %c0_15 = arith.constant 0 : index
    %41 = vector.load %arg1[%40, %c0_14, %c0_15] : memref<8x8x512xf32, #tpu.memory_space<vmem>>, vector<1x8x512xf32>
    %42 = vector.shape_cast %41 : vector<1x8x512xf32> to vector<8x512xf32>
    %c0_16 = arith.constant 0 : index
    %c0_17 = arith.constant 0 : index
    %43 = vector.load %arg2[%c0_16, %c0_17] : memref<128x512xf32, #tpu.memory_space<vmem>>, vector<128x512xf32>
    %cst_18 = arith.constant dense<0.000000e+00> : vector<8x512xf32>
    %44 = tpu.matmul %35, %43, %cst_18 {dimension_numbers = #tpu.dot_dimension_numbers<[1], [0], [0], [1], [0, 0, 1, 1], [], []>} : vector<8x128xf32>, vector<128x512xf32>, vector<8x512xf32> -> vector<8x512xf32>
    %45 = arith.addf %42, %44 : vector<8x512xf32>
    %46 = vector.extract_strided_slice %45 {offsets = [0, 0], sizes = [8, 128], strides = [1, 1]} : vector<8x512xf32> to vector<8x128xf32>
    %47 = arith.negf %46 : vector<8x128xf32>
    %48 = math.exp %47 : vector<8x128xf32>
    %cst_19 = arith.constant 1.000000e+00 : f32
    %49 = vector.broadcast %cst_19 : f32 to vector<8x128xf32>
    %50 = arith.addf %49, %48 : vector<8x128xf32>
    %51 = arith.divf %49, %50 : vector<8x128xf32>
    %52 = vector.extract_strided_slice %45 {offsets = [0, 128], sizes = [8, 128], strides = [1, 1]} : vector<8x512xf32> to vector<8x128xf32>
    %53 = arith.negf %52 : vector<8x128xf32>
    %54 = math.exp %53 : vector<8x128xf32>
    %cst_20 = arith.constant 1.000000e+00 : f32
    %55 = vector.broadcast %cst_20 : f32 to vector<8x128xf32>
    %56 = arith.addf %55, %54 : vector<8x128xf32>
    %57 = arith.divf %55, %56 : vector<8x128xf32>
    %58 = vector.extract_strided_slice %45 {offsets = [0, 256], sizes = [8, 128], strides = [1, 1]} : vector<8x512xf32> to vector<8x128xf32>
    %59 = math.tanh %58 : vector<8x128xf32>
    %60 = vector.extract_strided_slice %45 {offsets = [0, 384], sizes = [8, 128], strides = [1, 1]} : vector<8x512xf32> to vector<8x128xf32>
    %61 = arith.negf %60 : vector<8x128xf32>
    %62 = math.exp %61 : vector<8x128xf32>
    %cst_21 = arith.constant 1.000000e+00 : f32
    %63 = vector.broadcast %cst_21 : f32 to vector<8x128xf32>
    %64 = arith.addf %63, %62 : vector<8x128xf32>
    %65 = arith.divf %63, %64 : vector<8x128xf32>
    %66 = arith.mulf %57, %33 : vector<8x128xf32>
    %67 = arith.mulf %51, %59 : vector<8x128xf32>
    %68 = arith.addf %66, %67 : vector<8x128xf32>
    %69 = math.tanh %68 : vector<8x128xf32>
    %70 = arith.mulf %65, %69 : vector<8x128xf32>
    %71 = arith.index_cast %c1_i32 : i32 to index
    %c0_22 = arith.constant 0 : index
    %c0_23 = arith.constant 0 : index
    %72 = vector.load %arg3[%71, %c0_22, %c0_23] : memref<8x8x128xf32, #tpu.memory_space<vmem>>, vector<1x8x128xf32>
    %73 = vector.shape_cast %72 : vector<1x8x128xf32> to vector<8x128xf32>
    %74 = vector.shape_cast %70 : vector<8x128xf32> to vector<1x8x128xf32>
    tpu.vector_store %arg3[%71, %c0_22, %c0_23], %74 {strides = array<i32>} : memref<8x8x128xf32, #tpu.memory_space<vmem>>, vector<1x8x128xf32>,
    %c2_i32 = arith.constant 2 : i32
    %75 = arith.index_cast %c2_i32 : i32 to index
    %c0_24 = arith.constant 0 : index
    %c0_25 = arith.constant 0 : index
    %76 = vector.load %arg1[%75, %c0_24, %c0_25] : memref<8x8x512xf32, #tpu.memory_space<vmem>>, vector<1x8x512xf32>
    %77 = vector.shape_cast %76 : vector<1x8x512xf32> to vector<8x512xf32>
    %c0_26 = arith.constant 0 : index
    %c0_27 = arith.constant 0 : index
    %78 = vector.load %arg2[%c0_26, %c0_27] : memref<128x512xf32, #tpu.memory_space<vmem>>, vector<128x512xf32>
    %cst_28 = arith.constant dense<0.000000e+00> : vector<8x512xf32>
    %79 = tpu.matmul %70, %78, %cst_28 {dimension_numbers = #tpu.dot_dimension_numbers<[1], [0], [0], [1], [0, 0, 1, 1], [], []>} : vector<8x128xf32>, vector<128x512xf32>, vector<8x512xf32> -> vector<8x512xf32>
    %80 = arith.addf %77, %79 : vector<8x512xf32>
    %81 = vector.extract_strided_slice %80 {offsets = [0, 0], sizes = [8, 128], strides = [1, 1]} : vector<8x512xf32> to vector<8x128xf32>
    %82 = arith.negf %81 : vector<8x128xf32>
    %83 = math.exp %82 : vector<8x128xf32>
    %cst_29 = arith.constant 1.000000e+00 : f32
    %84 = vector.broadcast %cst_29 : f32 to vector<8x128xf32>
    %85 = arith.addf %84, %83 : vector<8x128xf32>
    %86 = arith.divf %84, %85 : vector<8x128xf32>
    %87 = vector.extract_strided_slice %80 {offsets = [0, 128], sizes = [8, 128], strides = [1, 1]} : vector<8x512xf32> to vector<8x128xf32>
    %88 = arith.negf %87 : vector<8x128xf32>
    %89 = math.exp %88 : vector<8x128xf32>
    %cst_30 = arith.constant 1.000000e+00 : f32
    %90 = vector.broadcast %cst_30 : f32 to vector<8x128xf32>
    %91 = arith.addf %90, %89 : vector<8x128xf32>
    %92 = arith.divf %90, %91 : vector<8x128xf32>
    %93 = vector.extract_strided_slice %80 {offsets = [0, 256], sizes = [8, 128], strides = [1, 1]} : vector<8x512xf32> to vector<8x128xf32>
    %94 = math.tanh %93 : vector<8x128xf32>
    %95 = vector.extract_strided_slice %80 {offsets = [0, 384], sizes = [8, 128], strides = [1, 1]} : vector<8x512xf32> to vector<8x128xf32>
    %96 = arith.negf %95 : vector<8x128xf32>
    %97 = math.exp %96 : vector<8x128xf32>
    %cst_31 = arith.constant 1.000000e+00 : f32
    %98 = vector.broadcast %cst_31 : f32 to vector<8x128xf32>
    %99 = arith.addf %98, %97 : vector<8x128xf32>
    %100 = arith.divf %98, %99 : vector<8x128xf32>
    %101 = arith.mulf %92, %68 : vector<8x128xf32>
    %102 = arith.mulf %86, %94 : vector<8x128xf32>
    %103 = arith.addf %101, %102 : vector<8x128xf32>
    %104 = math.tanh %103 : vector<8x128xf32>
    %105 = arith.mulf %100, %104 : vector<8x128xf32>
    %106 = arith.index_cast %c2_i32 : i32 to index
    %c0_32 = arith.constant 0 : index
    %c0_33 = arith.constant 0 : index
    %107 = vector.load %arg3[%106, %c0_32, %c0_33] : memref<8x8x128xf32, #tpu.memory_space<vmem>>, vector<1x8x128xf32>
    %108 = vector.shape_cast %107 : vector<1x8x128xf32> to vector<8x128xf32>
    %109 = vector.shape_cast %105 : vector<8x128xf32> to vector<1x8x128xf32>
    tpu.vector_store %arg3[%106, %c0_32, %c0_33], %109 {strides = array<i32>} : memref<8x8x128xf32, #tpu.memory_space<vmem>>, vector<1x8x128xf32>,
    %c3_i32 = arith.constant 3 : i32
    %110 = arith.index_cast %c3_i32 : i32 to index
    %c0_34 = arith.constant 0 : index
    %c0_35 = arith.constant 0 : index
    %111 = vector.load %arg1[%110, %c0_34, %c0_35] : memref<8x8x512xf32, #tpu.memory_space<vmem>>, vector<1x8x512xf32>
    %112 = vector.shape_cast %111 : vector<1x8x512xf32> to vector<8x512xf32>
    %c0_36 = arith.constant 0 : index
    %c0_37 = arith.constant 0 : index
    %113 = vector.load %arg2[%c0_36, %c0_37] : memref<128x512xf32, #tpu.memory_space<vmem>>, vector<128x512xf32>
    %cst_38 = arith.constant dense<0.000000e+00> : vector<8x512xf32>
    %114 = tpu.matmul %105, %113, %cst_38 {dimension_numbers = #tpu.dot_dimension_numbers<[1], [0], [0], [1], [0, 0, 1, 1], [], []>} : vector<8x128xf32>, vector<128x512xf32>, vector<8x512xf32> -> vector<8x512xf32>
    %115 = arith.addf %112, %114 : vector<8x512xf32>
    %116 = vector.extract_strided_slice %115 {offsets = [0, 0], sizes = [8, 128], strides = [1, 1]} : vector<8x512xf32> to vector<8x128xf32>
    %117 = arith.negf %116 : vector<8x128xf32>
    %118 = math.exp %117 : vector<8x128xf32>
    %cst_39 = arith.constant 1.000000e+00 : f32
    %119 = vector.broadcast %cst_39 : f32 to vector<8x128xf32>
    %120 = arith.addf %119, %118 : vector<8x128xf32>
    %121 = arith.divf %119, %120 : vector<8x128xf32>
    %122 = vector.extract_strided_slice %115 {offsets = [0, 128], sizes = [8, 128], strides = [1, 1]} : vector<8x512xf32> to vector<8x128xf32>
    %123 = arith.negf %122 : vector<8x128xf32>
    %124 = math.exp %123 : vector<8x128xf32>
    %cst_40 = arith.constant 1.000000e+00 : f32
    %125 = vector.broadcast %cst_40 : f32 to vector<8x128xf32>
    %126 = arith.addf %125, %124 : vector<8x128xf32>
    %127 = arith.divf %125, %126 : vector<8x128xf32>
    %128 = vector.extract_strided_slice %115 {offsets = [0, 256], sizes = [8, 128], strides = [1, 1]} : vector<8x512xf32> to vector<8x128xf32>
    %129 = math.tanh %128 : vector<8x128xf32>
    %130 = vector.extract_strided_slice %115 {offsets = [0, 384], sizes = [8, 128], strides = [1, 1]} : vector<8x512xf32> to vector<8x128xf32>
    %131 = arith.negf %130 : vector<8x128xf32>
    %132 = math.exp %131 : vector<8x128xf32>
    %cst_41 = arith.constant 1.000000e+00 : f32
    %133 = vector.broadcast %cst_41 : f32 to vector<8x128xf32>
    %134 = arith.addf %133, %132 : vector<8x128xf32>
    %135 = arith.divf %133, %134 : vector<8x128xf32>
    %136 = arith.mulf %127, %103 : vector<8x128xf32>
    %137 = arith.mulf %121, %129 : vector<8x128xf32>
    %138 = arith.addf %136, %137 : vector<8x128xf32>
    %139 = math.tanh %138 : vector<8x128xf32>
    %140 = arith.mulf %135, %139 : vector<8x128xf32>
    %141 = arith.index_cast %c3_i32 : i32 to index
    %c0_42 = arith.constant 0 : index
    %c0_43 = arith.constant 0 : index
    %142 = vector.load %arg3[%141, %c0_42, %c0_43] : memref<8x8x128xf32, #tpu.memory_space<vmem>>, vector<1x8x128xf32>
    %143 = vector.shape_cast %142 : vector<1x8x128xf32> to vector<8x128xf32>
    %144 = vector.shape_cast %140 : vector<8x128xf32> to vector<1x8x128xf32>
    tpu.vector_store %arg3[%141, %c0_42, %c0_43], %144 {strides = array<i32>} : memref<8x8x128xf32, #tpu.memory_space<vmem>>, vector<1x8x128xf32>,
    %c4_i32 = arith.constant 4 : i32
    %145 = arith.index_cast %c4_i32 : i32 to index
    %c0_44 = arith.constant 0 : index
    %c0_45 = arith.constant 0 : index
    %146 = vector.load %arg1[%145, %c0_44, %c0_45] : memref<8x8x512xf32, #tpu.memory_space<vmem>>, vector<1x8x512xf32>
    %147 = vector.shape_cast %146 : vector<1x8x512xf32> to vector<8x512xf32>
    %c0_46 = arith.constant 0 : index
    %c0_47 = arith.constant 0 : index
    %148 = vector.load %arg2[%c0_46, %c0_47] : memref<128x512xf32, #tpu.memory_space<vmem>>, vector<128x512xf32>
    %cst_48 = arith.constant dense<0.000000e+00> : vector<8x512xf32>
    %149 = tpu.matmul %140, %148, %cst_48 {dimension_numbers = #tpu.dot_dimension_numbers<[1], [0], [0], [1], [0, 0, 1, 1], [], []>} : vector<8x128xf32>, vector<128x512xf32>, vector<8x512xf32> -> vector<8x512xf32>
    %150 = arith.addf %147, %149 : vector<8x512xf32>
    %151 = vector.extract_strided_slice %150 {offsets = [0, 0], sizes = [8, 128], strides = [1, 1]} : vector<8x512xf32> to vector<8x128xf32>
    %152 = arith.negf %151 : vector<8x128xf32>
    %153 = math.exp %152 : vector<8x128xf32>
    %cst_49 = arith.constant 1.000000e+00 : f32
    %154 = vector.broadcast %cst_49 : f32 to vector<8x128xf32>
    %155 = arith.addf %154, %153 : vector<8x128xf32>
    %156 = arith.divf %154, %155 : vector<8x128xf32>
    %157 = vector.extract_strided_slice %150 {offsets = [0, 128], sizes = [8, 128], strides = [1, 1]} : vector<8x512xf32> to vector<8x128xf32>
    %158 = arith.negf %157 : vector<8x128xf32>
    %159 = math.exp %158 : vector<8x128xf32>
    %cst_50 = arith.constant 1.000000e+00 : f32
    %160 = vector.broadcast %cst_50 : f32 to vector<8x128xf32>
    %161 = arith.addf %160, %159 : vector<8x128xf32>
    %162 = arith.divf %160, %161 : vector<8x128xf32>
    %163 = vector.extract_strided_slice %150 {offsets = [0, 256], sizes = [8, 128], strides = [1, 1]} : vector<8x512xf32> to vector<8x128xf32>
    %164 = math.tanh %163 : vector<8x128xf32>
    %165 = vector.extract_strided_slice %150 {offsets = [0, 384], sizes = [8, 128], strides = [1, 1]} : vector<8x512xf32> to vector<8x128xf32>
    %166 = arith.negf %165 : vector<8x128xf32>
    %167 = math.exp %166 : vector<8x128xf32>
    %cst_51 = arith.constant 1.000000e+00 : f32
    %168 = vector.broadcast %cst_51 : f32 to vector<8x128xf32>
    %169 = arith.addf %168, %167 : vector<8x128xf32>
    %170 = arith.divf %168, %169 : vector<8x128xf32>
    %171 = arith.mulf %162, %138 : vector<8x128xf32>
    %172 = arith.mulf %156, %164 : vector<8x128xf32>
    %173 = arith.addf %171, %172 : vector<8x128xf32>
    %174 = math.tanh %173 : vector<8x128xf32>
    %175 = arith.mulf %170, %174 : vector<8x128xf32>
    %176 = arith.index_cast %c4_i32 : i32 to index
    %c0_52 = arith.constant 0 : index
    %c0_53 = arith.constant 0 : index
    %177 = vector.load %arg3[%176, %c0_52, %c0_53] : memref<8x8x128xf32, #tpu.memory_space<vmem>>, vector<1x8x128xf32>
    %178 = vector.shape_cast %177 : vector<1x8x128xf32> to vector<8x128xf32>
    %179 = vector.shape_cast %175 : vector<8x128xf32> to vector<1x8x128xf32>
    tpu.vector_store %arg3[%176, %c0_52, %c0_53], %179 {strides = array<i32>} : memref<8x8x128xf32, #tpu.memory_space<vmem>>, vector<1x8x128xf32>,
    %c5_i32 = arith.constant 5 : i32
    %180 = arith.index_cast %c5_i32 : i32 to index
    %c0_54 = arith.constant 0 : index
    %c0_55 = arith.constant 0 : index
    %181 = vector.load %arg1[%180, %c0_54, %c0_55] : memref<8x8x512xf32, #tpu.memory_space<vmem>>, vector<1x8x512xf32>
    %182 = vector.shape_cast %181 : vector<1x8x512xf32> to vector<8x512xf32>
    %c0_56 = arith.constant 0 : index
    %c0_57 = arith.constant 0 : index
    %183 = vector.load %arg2[%c0_56, %c0_57] : memref<128x512xf32, #tpu.memory_space<vmem>>, vector<128x512xf32>
    %cst_58 = arith.constant dense<0.000000e+00> : vector<8x512xf32>
    %184 = tpu.matmul %175, %183, %cst_58 {dimension_numbers = #tpu.dot_dimension_numbers<[1], [0], [0], [1], [0, 0, 1, 1], [], []>} : vector<8x128xf32>, vector<128x512xf32>, vector<8x512xf32> -> vector<8x512xf32>
    %185 = arith.addf %182, %184 : vector<8x512xf32>
    %186 = vector.extract_strided_slice %185 {offsets = [0, 0], sizes = [8, 128], strides = [1, 1]} : vector<8x512xf32> to vector<8x128xf32>
    %187 = arith.negf %186 : vector<8x128xf32>
    %188 = math.exp %187 : vector<8x128xf32>
    %cst_59 = arith.constant 1.000000e+00 : f32
    %189 = vector.broadcast %cst_59 : f32 to vector<8x128xf32>
    %190 = arith.addf %189, %188 : vector<8x128xf32>
    %191 = arith.divf %189, %190 : vector<8x128xf32>
    %192 = vector.extract_strided_slice %185 {offsets = [0, 128], sizes = [8, 128], strides = [1, 1]} : vector<8x512xf32> to vector<8x128xf32>
    %193 = arith.negf %192 : vector<8x128xf32>
    %194 = math.exp %193 : vector<8x128xf32>
    %cst_60 = arith.constant 1.000000e+00 : f32
    %195 = vector.broadcast %cst_60 : f32 to vector<8x128xf32>
    %196 = arith.addf %195, %194 : vector<8x128xf32>
    %197 = arith.divf %195, %196 : vector<8x128xf32>
    %198 = vector.extract_strided_slice %185 {offsets = [0, 256], sizes = [8, 128], strides = [1, 1]} : vector<8x512xf32> to vector<8x128xf32>
    %199 = math.tanh %198 : vector<8x128xf32>
    %200 = vector.extract_strided_slice %185 {offsets = [0, 384], sizes = [8, 128], strides = [1, 1]} : vector<8x512xf32> to vector<8x128xf32>
    %201 = arith.negf %200 : vector<8x128xf32>
    %202 = math.exp %201 : vector<8x128xf32>
    %cst_61 = arith.constant 1.000000e+00 : f32
    %203 = vector.broadcast %cst_61 : f32 to vector<8x128xf32>
    %204 = arith.addf %203, %202 : vector<8x128xf32>
    %205 = arith.divf %203, %204 : vector<8x128xf32>
    %206 = arith.mulf %197, %173 : vector<8x128xf32>
    %207 = arith.mulf %191, %199 : vector<8x128xf32>
    %208 = arith.addf %206, %207 : vector<8x128xf32>
    %209 = math.tanh %208 : vector<8x128xf32>
    %210 = arith.mulf %205, %209 : vector<8x128xf32>
    %211 = arith.index_cast %c5_i32 : i32 to index
    %c0_62 = arith.constant 0 : index
    %c0_63 = arith.constant 0 : index
    %212 = vector.load %arg3[%211, %c0_62, %c0_63] : memref<8x8x128xf32, #tpu.memory_space<vmem>>, vector<1x8x128xf32>
    %213 = vector.shape_cast %212 : vector<1x8x128xf32> to vector<8x128xf32>
    %214 = vector.shape_cast %210 : vector<8x128xf32> to vector<1x8x128xf32>
    tpu.vector_store %arg3[%211, %c0_62, %c0_63], %214 {strides = array<i32>} : memref<8x8x128xf32, #tpu.memory_space<vmem>>, vector<1x8x128xf32>,
    %c6_i32 = arith.constant 6 : i32
    %215 = arith.index_cast %c6_i32 : i32 to index
    %c0_64 = arith.constant 0 : index
    %c0_65 = arith.constant 0 : index
    %216 = vector.load %arg1[%215, %c0_64, %c0_65] : memref<8x8x512xf32, #tpu.memory_space<vmem>>, vector<1x8x512xf32>
    %217 = vector.shape_cast %216 : vector<1x8x512xf32> to vector<8x512xf32>
    %c0_66 = arith.constant 0 : index
    %c0_67 = arith.constant 0 : index
    %218 = vector.load %arg2[%c0_66, %c0_67] : memref<128x512xf32, #tpu.memory_space<vmem>>, vector<128x512xf32>
    %cst_68 = arith.constant dense<0.000000e+00> : vector<8x512xf32>
    %219 = tpu.matmul %210, %218, %cst_68 {dimension_numbers = #tpu.dot_dimension_numbers<[1], [0], [0], [1], [0, 0, 1, 1], [], []>} : vector<8x128xf32>, vector<128x512xf32>, vector<8x512xf32> -> vector<8x512xf32>
    %220 = arith.addf %217, %219 : vector<8x512xf32>
    %221 = vector.extract_strided_slice %220 {offsets = [0, 0], sizes = [8, 128], strides = [1, 1]} : vector<8x512xf32> to vector<8x128xf32>
    %222 = arith.negf %221 : vector<8x128xf32>
    %223 = math.exp %222 : vector<8x128xf32>
    %cst_69 = arith.constant 1.000000e+00 : f32
    %224 = vector.broadcast %cst_69 : f32 to vector<8x128xf32>
    %225 = arith.addf %224, %223 : vector<8x128xf32>
    %226 = arith.divf %224, %225 : vector<8x128xf32>
    %227 = vector.extract_strided_slice %220 {offsets = [0, 128], sizes = [8, 128], strides = [1, 1]} : vector<8x512xf32> to vector<8x128xf32>
    %228 = arith.negf %227 : vector<8x128xf32>
    %229 = math.exp %228 : vector<8x128xf32>
    %cst_70 = arith.constant 1.000000e+00 : f32
    %230 = vector.broadcast %cst_70 : f32 to vector<8x128xf32>
    %231 = arith.addf %230, %229 : vector<8x128xf32>
    %232 = arith.divf %230, %231 : vector<8x128xf32>
    %233 = vector.extract_strided_slice %220 {offsets = [0, 256], sizes = [8, 128], strides = [1, 1]} : vector<8x512xf32> to vector<8x128xf32>
    %234 = math.tanh %233 : vector<8x128xf32>
    %235 = vector.extract_strided_slice %220 {offsets = [0, 384], sizes = [8, 128], strides = [1, 1]} : vector<8x512xf32> to vector<8x128xf32>
    %236 = arith.negf %235 : vector<8x128xf32>
    %237 = math.exp %236 : vector<8x128xf32>
    %cst_71 = arith.constant 1.000000e+00 : f32
    %238 = vector.broadcast %cst_71 : f32 to vector<8x128xf32>
    %239 = arith.addf %238, %237 : vector<8x128xf32>
    %240 = arith.divf %238, %239 : vector<8x128xf32>
    %241 = arith.mulf %232, %208 : vector<8x128xf32>
    %242 = arith.mulf %226, %234 : vector<8x128xf32>
    %243 = arith.addf %241, %242 : vector<8x128xf32>
    %244 = math.tanh %243 : vector<8x128xf32>
    %245 = arith.mulf %240, %244 : vector<8x128xf32>
    %246 = arith.index_cast %c6_i32 : i32 to index
    %c0_72 = arith.constant 0 : index
    %c0_73 = arith.constant 0 : index
    %247 = vector.load %arg3[%246, %c0_72, %c0_73] : memref<8x8x128xf32, #tpu.memory_space<vmem>>, vector<1x8x128xf32>
    %248 = vector.shape_cast %247 : vector<1x8x128xf32> to vector<8x128xf32>
    %249 = vector.shape_cast %245 : vector<8x128xf32> to vector<1x8x128xf32>
    tpu.vector_store %arg3[%246, %c0_72, %c0_73], %249 {strides = array<i32>} : memref<8x8x128xf32, #tpu.memory_space<vmem>>, vector<1x8x128xf32>,
    %c7_i32 = arith.constant 7 : i32
    %250 = arith.index_cast %c7_i32 : i32 to index
    %c0_74 = arith.constant 0 : index
    %c0_75 = arith.constant 0 : index
    %251 = vector.load %arg1[%250, %c0_74, %c0_75] : memref<8x8x512xf32, #tpu.memory_space<vmem>>, vector<1x8x512xf32>
    %252 = vector.shape_cast %251 : vector<1x8x512xf32> to vector<8x512xf32>
    %c0_76 = arith.constant 0 : index
    %c0_77 = arith.constant 0 : index
    %253 = vector.load %arg2[%c0_76, %c0_77] : memref<128x512xf32, #tpu.memory_space<vmem>>, vector<128x512xf32>
    %cst_78 = arith.constant dense<0.000000e+00> : vector<8x512xf32>
    %254 = tpu.matmul %245, %253, %cst_78 {dimension_numbers = #tpu.dot_dimension_numbers<[1], [0], [0], [1], [0, 0, 1, 1], [], []>} : vector<8x128xf32>, vector<128x512xf32>, vector<8x512xf32> -> vector<8x512xf32>
    %255 = arith.addf %252, %254 : vector<8x512xf32>
    %256 = vector.extract_strided_slice %255 {offsets = [0, 0], sizes = [8, 128], strides = [1, 1]} : vector<8x512xf32> to vector<8x128xf32>
    %257 = arith.negf %256 : vector<8x128xf32>
    %258 = math.exp %257 : vector<8x128xf32>
    %cst_79 = arith.constant 1.000000e+00 : f32
    %259 = vector.broadcast %cst_79 : f32 to vector<8x128xf32>
    %260 = arith.addf %259, %258 : vector<8x128xf32>
    %261 = arith.divf %259, %260 : vector<8x128xf32>
    %262 = vector.extract_strided_slice %255 {offsets = [0, 128], sizes = [8, 128], strides = [1, 1]} : vector<8x512xf32> to vector<8x128xf32>
    %263 = arith.negf %262 : vector<8x128xf32>
    %264 = math.exp %263 : vector<8x128xf32>
    %cst_80 = arith.constant 1.000000e+00 : f32
    %265 = vector.broadcast %cst_80 : f32 to vector<8x128xf32>
    %266 = arith.addf %265, %264 : vector<8x128xf32>
    %267 = arith.divf %265, %266 : vector<8x128xf32>
    %268 = vector.extract_strided_slice %255 {offsets = [0, 256], sizes = [8, 128], strides = [1, 1]} : vector<8x512xf32> to vector<8x128xf32>
    %269 = math.tanh %268 : vector<8x128xf32>
    %270 = vector.extract_strided_slice %255 {offsets = [0, 384], sizes = [8, 128], strides = [1, 1]} : vector<8x512xf32> to vector<8x128xf32>
    %271 = arith.negf %270 : vector<8x128xf32>
    %272 = math.exp %271 : vector<8x128xf32>
    %cst_81 = arith.constant 1.000000e+00 : f32
    %273 = vector.broadcast %cst_81 : f32 to vector<8x128xf32>
    %274 = arith.addf %273, %272 : vector<8x128xf32>
    %275 = arith.divf %273, %274 : vector<8x128xf32>
    %276 = arith.mulf %267, %243 : vector<8x128xf32>
    %277 = arith.mulf %261, %269 : vector<8x128xf32>
    %278 = arith.addf %276, %277 : vector<8x128xf32>
    %279 = math.tanh %278 : vector<8x128xf32>
    %280 = arith.mulf %275, %279 : vector<8x128xf32>
    %281 = arith.index_cast %c7_i32 : i32 to index
    %c0_82 = arith.constant 0 : index
    %c0_83 = arith.constant 0 : index
    %282 = vector.load %arg3[%281, %c0_82, %c0_83] : memref<8x8x128xf32, #tpu.memory_space<vmem>>, vector<1x8x128xf32>
    %283 = vector.shape_cast %282 : vector<1x8x128xf32> to vector<8x128xf32>
    %284 = vector.shape_cast %280 : vector<8x128xf32> to vector<1x8x128xf32>
    tpu.vector_store %arg3[%281, %c0_82, %c0_83], %284 {strides = array<i32>} : memref<8x8x128xf32, #tpu.memory_space<vmem>>, vector<1x8x128xf32>,
    %c8_i32 = arith.constant 8 : i32
    %c0_84 = arith.constant 0 : index
    %c0_85 = arith.constant 0 : index
    %285 = vector.load %arg6[%c0_84, %c0_85] : memref<8x128xf32, #tpu.memory_space<vmem>>, vector<8x128xf32>
    tpu.vector_store %arg6[%c0_84, %c0_85], %280 {strides = array<i32>} : memref<8x128xf32, #tpu.memory_space<vmem>>, vector<8x128xf32>,
    %c0_86 = arith.constant 0 : index
    %c0_87 = arith.constant 0 : index
    %286 = vector.load %arg7[%c0_86, %c0_87] : memref<8x128xf32, #tpu.memory_space<vmem>>, vector<8x128xf32>
    tpu.vector_store %arg7[%c0_86, %c0_87], %278 {strides = array<i32>} : memref<8x128xf32, #tpu.memory_space<vmem>>, vector<8x128xf32>,
    %c0_i32_88 = arith.constant 0 : i32
    %287 = arith.cmpi eq, %arg0, %c0_i32_88 : i32
    %288 = arith.extui %287 : i1 to i32
    %c0_i32_89 = arith.constant 0 : i32
    %289 = arith.cmpi ne, %288, %c0_i32_89 : i32
    scf.if %289 {
      %c0_90 = arith.constant 0 : index
      %c0_91 = arith.constant 0 : index
      %290 = vector.load %arg4[%c0_90, %c0_91] : memref<8x128xf32, #tpu.memory_space<vmem>>, vector<8x128xf32>
      tpu.vector_store %arg4[%c0_90, %c0_91], %280 {strides = array<i32>} : memref<8x128xf32, #tpu.memory_space<vmem>>, vector<8x128xf32>,
      %c0_92 = arith.constant 0 : index
      %c0_93 = arith.constant 0 : index
      %291 = vector.load %arg5[%c0_92, %c0_93] : memref<8x128xf32, #tpu.memory_space<vmem>>, vector<8x128xf32>
      tpu.vector_store %arg5[%c0_92, %c0_93], %278 {strides = array<i32>} : memref<8x128xf32, #tpu.memory_space<vmem>>, vector<8x128xf32>,
    } else {
    }
    return
  }
  func.func @transform_0(%arg0: i32) -> (i32, i32, i32) {
    %c0_i32 = arith.constant 0 : i32
    %c0_i32_0 = arith.constant 0 : i32
    %c0_i32_1 = arith.constant 0 : i32
    return %arg0, %c0_i32, %c0_i32_0 : i32, i32, i32
  }
  func.func @transform_1(%arg0: i32) -> (i32, i32) {
    %c0_i32 = arith.constant 0 : i32
    %c0_i32_0 = arith.constant 0 : i32
    %c0_i32_1 = arith.constant 0 : i32
    return %c0_i32, %c0_i32_0 : i32, i32
  }
  func.func @transform_2(%arg0: i32) -> (i32, i32, i32) {
    %c0_i32 = arith.constant 0 : i32
    %c0_i32_0 = arith.constant 0 : i32
    %c0_i32_1 = arith.constant 0 : i32
    return %arg0, %c0_i32, %c0_i32_0 : i32, i32, i32
  }
  func.func @transform_3(%arg0: i32) -> (i32, i32) {
    %c0_i32 = arith.constant 0 : i32
    %c0_i32_0 = arith.constant 0 : i32
    %c0_i32_1 = arith.constant 0 : i32
    return %c0_i32, %c0_i32_0 : i32, i32
  }
  func.func @transform_4(%arg0: i32) -> (i32, i32) {
    %c0_i32 = arith.constant 0 : i32
    %c0_i32_0 = arith.constant 0 : i32
    %c0_i32_1 = arith.constant 0 : i32
    return %c0_i32, %c0_i32_0 : i32, i32
  }
}

</mosaic_0001>

<bundles_post_ra>
// kernel: tpu_custom_call.1
= control target key start
LH: loop header
LB: loop body
LE: loop exit
PB: predicated region body
PF: predicated region fallthrough
CT: control target
= control target key end

     0   :  { %10 = vsyncpa [#allocation5], 0  ;;  %s3352_s0 = inlined_call_operand.hbm [shape: f32[8,8,512], index: 0, kind: input, shape index: {}]   ;;  %s3353_s1 = inlined_call_operand.hbm [shape: f32[128,512], index: 1, kind: input, shape index: {}]   ;;  %s3354_s2 = inlined_call_operand.hbm [shape: f32[8,8,128], index: 2, kind: output, shape index: {0}]   ;;  %s3355_s3 = inlined_call_operand.hbm [shape: f32[8,128], index: 3, kind: output, shape index: {1}]   ;;  %s3356_s4 = inlined_call_operand.hbm [shape: f32[8,128], index: 4, kind: output, shape index: {2}]  }
   0x1   :  { %11 = vsyncpa [#allocation8], 0 }
   0x2   :  { %12 = vsyncpa [#allocation6], 0 }
   0x3   :  { %13 = vsyncpa [#allocation11], 0  ;;  %s2822_s15 = smov [#allocation4]   ;;  %s2704_s19 = scalar_lea.hbm %s3352_s0, 4096 }
   0x4   :  { %s19_s16 = sshll.u32 %s2822_s15, 4  ;;  %p2705_p0 = scmp.ne.s32.totalorder %s3352_s0, %s2704_s19  ;;  %s20_s16 = int_to_ptr.vmem [resolvable:$true] %s19_s16 }
   0x5   :  { %p2708_p1 = scmp.lt.u32.totalorder %s2704_s19, %s3352_s0 }
   0x7   :  { %p2710_p2 = pnand %p2708_p1, %p2705_p0 }
   0x9   :  { %2713 = shalt.err (!%p2710_p2)
}
   0xa   :  { %s2714_s24 = scalar_lea.vmem %s20_s16, 4096  ;;  %p2719_p4 = scmp.lt.s32.totalorder %s20_s16, %s20_s16 }
   0xb   :  { %p2715_p3 = scmp.ne.s32.totalorder %s20_s16, %s2714_s24  ;;  %p2720_p5 = scmp.lt.s32.totalorder %s2714_s24, %s2714_s24 }
   0xd   :  { %p2721_p6 = por %p2720_p5, %p2719_p4 }
   0xf   :  { %p2722_p7 = pnand %p2721_p6, %p2715_p3 }
  0x11   :  { %2725 = shalt.err (!%p2722_p7)
}
  0x12   :  { %s2823_s25 = smov 512   ;;  %s2824_s26 = smov 32  }
  0x13   :  { %25 = dma.hbm_to_vmem [thread:$0]  %s3352_s0, 4096, %s20_s16, [#allocation5], %s2823_s25, %s2823_s25, %s2824_s26  }
  0x14   :  { %s2825_s29 = smov [#allocation7]   ;;  %s2726_s7 = scalar_lea.hbm %s3353_s1, 8192 }
  0x15   :  { %s31_s30 = sshll.u32 %s2825_s29, 4  ;;  %p2727_p8 = scmp.ne.s32.totalorder %s3353_s1, %s2726_s7  ;;  %s32_s30 = int_to_ptr.vmem [resolvable:$true] %s31_s30 }
  0x16   :  { %p2730_p9 = scmp.lt.u32.totalorder %s2726_s7, %s3353_s1 }
  0x18   :  { %p2732_p10 = pnand %p2730_p9, %p2727_p8 }
  0x1a   :  { %2735 = shalt.err (!%p2732_p10)
}
  0x1b   :  { %s2736_s12 = scalar_lea.vmem %s32_s30, 8192  ;;  %p2741_p12 = scmp.lt.s32.totalorder %s32_s30, %s32_s30 }
  0x1c   :  { %p2737_p11 = scmp.ne.s32.totalorder %s32_s30, %s2736_s12  ;;  %p2742_p13 = scmp.lt.s32.totalorder %s2736_s12, %s2736_s12 }
  0x1e   :  { %p2743_p0 = por %p2742_p13, %p2741_p12 }
  0x20   :  { %p2744_p1 = pnand %p2743_p0, %p2737_p11 }
  0x22   :  { %2747 = shalt.err (!%p2744_p1)
}
  0x23   :  { %37 = dma.hbm_to_vmem [thread:$0]  %s3353_s1, 8192, %s32_s30, [#allocation8], %s2823_s25, %s2823_s25, %s2824_s26  }
  0x24   :  { %2814 = dma.done.wait [#allocation5], 4096  }
  0x25   :  { %2815 = vsyncadd [#allocation5], 4294963200 }
  0x26   :  { %2816 = dma.done.wait [#allocation8], 8192  }
  0x27   :  { %2817 = vsyncadd [#allocation8], 4294959104  ;;  %v2826_v0 = vmov 0.0   ;;  %v57_v1 = vld [vmem:[#allocation7 + $0x8] sm:$0xff]  ;;  %v56_v3 = vld [vmem:[#allocation7] sm:$0xff]  ;;  %s2827_s1 = smov [#allocation10]  }
  0x28   :  { %184 = vmatprep.mubr.f32.mxu0 %v2826_v0  ;;  %255 = vmatprep.mubr.f32.mxu1 %v2826_v0  ;;  %v61_v2 = vld [vmem:[#allocation7 + $0x28] sm:$0xff]  ;;  %v60_v5 = vld [vmem:[#allocation7 + $0x20] sm:$0xff]  ;;  %v59_v19 = vld [vmem:[#allocation7 + $0x18] sm:$0xff]  ;;  %s2003_s14 = sshll.u32 %s2827_s1, 4  ;;  %s2828_s15 = smov [#allocation9]   ;;  %s2004_s14 = int_to_ptr.vmem [resolvable:$true] %s2003_s14 }
  0x29   :  { %v2883_v4 = vpack.c.bf16 %v61_v2, %v57_v1  ;;  %v65_v6 = vld [vmem:[#allocation7 + $0x48] sm:$0xff]  ;;  %v2885_v8 = vpack.c.bf16 %v60_v5, %v56_v3  ;;  %v64_v10 = vld [vmem:[#allocation7 + $0x40] sm:$0xff]  ;;  %v63_v20 = vld [vmem:[#allocation7 + $0x38] sm:$0xff]  ;;  %s1990_s16 = sshll.u32 %s2828_s15, 4  ;;  %s2829_s17 = smov [#allocation12]   ;;  %s3302_s16 = int_to_ptr.vmem [resolvable:$true] %s1990_s16 }
  0x2a   :  { %v69_v7 = vld [vmem:[#allocation7 + $0x68] sm:$0xff]  ;;  %v68_v11 = vld [vmem:[#allocation7 + $0x60] sm:$0xff]  ;;  %v2896_v22 = vpack.c.bf16 %v63_v20, %v59_v19  ;;  %v58_v23 = vld [vmem:[#allocation7 + $0x10] sm:$0xff]  ;;  %s2013_s18 = sshll.u32 %s2829_s17, 4  ;;  %s2748_s19 = scalar_lea.vmem %s2004_s14, 128  ;;  %s3304_s18 = int_to_ptr.vmem [resolvable:$true] %s2013_s18 }
  0x2b   :  { %v2887_v9 = vpack.c.bf16 %v69_v7, %v65_v6  ;;  %v73_v12 = vld [vmem:[#allocation7 + $0x88] sm:$0xff]  ;;  %2055 = vmatprep.subr.bf16.mxu0 %v2883_v4  ;;  %v2891_v14 = vpack.c.bf16 %v68_v11, %v64_v10  ;;  %v72_v15 = vld [vmem:[#allocation7 + $0x80] sm:$0xff]  ;;  %v62_v24 = vld [vmem:[#allocation7 + $0x30] sm:$0xff]  ;;  %p2749_p2 = scmp.ne.s32.totalorder %s2004_s14, %s2748_s19  ;;  %p2753_p3 = scmp.lt.s32.totalorder %s2004_s14, %s2004_s14 }
  0x2c   :  { %v77_v13 = vld [vmem:[#allocation7 + $0xa8] sm:$0xff]  ;;  %2057 = vmatpush1.bf16.msra.mxu0 %v2885_v8  ;;  %v76_v16 = vld [vmem:[#allocation7 + $0xa0] sm:$0xff]  ;;  %v2898_v25 = vpack.c.bf16 %v62_v24, %v58_v23  ;;  %2087 = vmatprep.subr.bf16.mxu1 %v2896_v22  ;;  %v67_v27 = vld [vmem:[#allocation7 + $0x58] sm:$0xff]  ;;  %p2754_p4 = scmp.lt.s32.totalorder %s2748_s19, %s2748_s19 }
  0x2d   :  { %2059 = vmatprep.subr.bf16.mxu0 %v2887_v9  ;;  %v2894_v17 = vpack.c.bf16 %v77_v13, %v73_v12  ;;  %v81_v18 = vld [vmem:[#allocation7 + $0xc8] sm:$0xff]  ;;  %v2901_v26 = vpack.c.bf16 %v76_v16, %v72_v15  ;;  %v71_v28 = vld [vmem:[#allocation7 + $0x78] sm:$0xff]  ;;  %v66_v29 = vld [vmem:[#allocation7 + $0x50] sm:$0xff] }
  0x2e   :  { %v85_v21 = vld [vmem:[#allocation7 + $0xe8] sm:$0xff]  ;;  %v80_v31 = vld [vmem:[#allocation7 + $0xc0] sm:$0xff]  ;;  %2089 = vmatpush1.bf16.msra.mxu1 %v2898_v25  ;;  %v2908_v33 = vpack.c.bf16 %v71_v28, %v67_v27  ;;  %v70_v34 = vld [vmem:[#allocation7 + $0x70] sm:$0xff]  ;;  %p2755_p5 = por %p2754_p4, %p2753_p3 }
  0x2f   :  { %v2905_v30 = vpack.c.bf16 %v85_v21, %v81_v18  ;;  %v84_v32 = vld [vmem:[#allocation7 + $0xe0] sm:$0xff]  ;;  %v89_v35 = vld [vmem:[#allocation7 + $0x108] sm:$0xff]  ;;  %v2910_v37 = vpack.c.bf16 %v70_v34, %v66_v29  ;;  %v75_v38 = vld [vmem:[#allocation7 + $0x98] sm:$0xff] }
  0x30   :  { %2061 = vmatpush1.bf16.msra.mxu0 %v2891_v14  ;;  %v93_v36 = vld [vmem:[#allocation7 + $0x128] sm:$0xff]  ;;  %2091 = vmatprep.subr.bf16.mxu1 %v2908_v33  ;;  %v79_v39 = vld [vmem:[#allocation7 + $0xb8] sm:$0xff]  ;;  %v74_v40 = vld [vmem:[#allocation7 + $0x90] sm:$0xff]  ;;  %v2914_v42 = vpack.c.bf16 %v84_v32, %v80_v31  ;;  %p2756_p6 = pnand %p2755_p5, %p2749_p2 }
  0x31   :  { %2063 = vmatprep.subr.bf16.mxu0 %v2894_v17  ;;  %v78_v41 = vld [vmem:[#allocation7 + $0xb0] sm:$0xff]  ;;  %v88_v43 = vld [vmem:[#allocation7 + $0x100] sm:$0xff]  ;;  %v2916_v45 = vpack.c.bf16 %v79_v39, %v75_v38  ;;  %v2919_v46 = vpack.c.bf16 %v93_v36, %v89_v35  ;;  %v97_v47 = vld [vmem:[#allocation7 + $0x148] sm:$0xff] }
  0x32   :  { %v92_v44 = vld [vmem:[#allocation7 + $0x120] sm:$0xff]  ;;  %2093 = vmatpush1.bf16.msra.mxu1 %v2910_v37  ;;  %v2922_v48 = vpack.c.bf16 %v78_v41, %v74_v40  ;;  %v83_v49 = vld [vmem:[#allocation7 + $0xd8] sm:$0xff]  ;;  %v101_v51 = vld [vmem:[#allocation7 + $0x168] sm:$0xff] }
  0x33   :  { %v87_v50 = vld [vmem:[#allocation7 + $0xf8] sm:$0xff]  ;;  %2095 = vmatprep.subr.bf16.mxu1 %v2916_v45  ;;  %v82_v53 = vld [vmem:[#allocation7 + $0xd0] sm:$0xff]  ;;  %v2928_v55 = vpack.c.bf16 %v92_v44, %v88_v43  ;;  %v2931_v58 = vpack.c.bf16 %v101_v51, %v97_v47  ;;  %v96_v59 = vld [vmem:[#allocation7 + $0x140] sm:$0xff] }
  0x34   :  { %2065 = vmatpush1.bf16.msra.mxu0 %v2901_v26  ;;  %v2925_v52 = vpack.c.bf16 %v87_v50, %v83_v49  ;;  %v86_v54 = vld [vmem:[#allocation7 + $0xf0] sm:$0xff]  ;;  %v91_v56 = vld [vmem:[#allocation7 + $0x118] sm:$0xff]  ;;  %v100_v60 = vld [vmem:[#allocation7 + $0x160] sm:$0xff] }
  0x35   :  { %2067 = vmatprep.subr.bf16.mxu0 %v2905_v30  ;;  %v95_v57 = vld [vmem:[#allocation7 + $0x138] sm:$0xff]  ;;  %v105_v61 = vld [vmem:[#allocation7 + $0x188] sm:$0xff]  ;;  %v2934_v62 = vpack.c.bf16 %v86_v54, %v82_v53  ;;  %v90_v2 = vld [vmem:[#allocation7 + $0x110] sm:$0xff]  ;;  %v2940_v7 = vpack.c.bf16 %v100_v60, %v96_v59 }
  0x36   :  { %2097 = vmatpush1.bf16.msra.mxu1 %v2922_v48  ;;  %v109_v63 = vld [vmem:[#allocation7 + $0x1a8] sm:$0xff]  ;;  %v2937_v1 = vpack.c.bf16 %v95_v57, %v91_v56  ;;  %v94_v3 = vld [vmem:[#allocation7 + $0x130] sm:$0xff]  ;;  %v99_v5 = vld [vmem:[#allocation7 + $0x158] sm:$0xff] }
  0x37   :  { %2099 = vmatprep.subr.bf16.mxu1 %v2925_v52  ;;  %v103_v6 = vld [vmem:[#allocation7 + $0x178] sm:$0xff]  ;;  %v2943_v10 = vpack.c.bf16 %v109_v63, %v105_v61  ;;  %v104_v11 = vld [vmem:[#allocation7 + $0x180] sm:$0xff]  ;;  %v113_v13 = vld [vmem:[#allocation7 + $0x1c8] sm:$0xff]  ;;  %v2946_v15 = vpack.c.bf16 %v94_v3, %v90_v2 }
  0x38   :  { %2069 = vmatpush1.bf16.msra.mxu0 %v2914_v42  ;;  %v108_v12 = vld [vmem:[#allocation7 + $0x1a0] sm:$0xff]  ;;  %v117_v16 = vld [vmem:[#allocation7 + $0x1e8] sm:$0xff]  ;;  %v2949_v18 = vpack.c.bf16 %v103_v6, %v99_v5  ;;  %v98_v19 = vld [vmem:[#allocation7 + $0x150] sm:$0xff] }
  0x39   :  { %2071 = vmatprep.subr.bf16.mxu0 %v2919_v46  ;;  %v102_v20 = vld [vmem:[#allocation7 + $0x170] sm:$0xff]  ;;  %v107_v21 = vld [vmem:[#allocation7 + $0x198] sm:$0xff]  ;;  %v2952_v24 = vpack.c.bf16 %v108_v12, %v104_v11  ;;  %v2955_v27 = vpack.c.bf16 %v117_v16, %v113_v13  ;;  %v112_v28 = vld [vmem:[#allocation7 + $0x1c0] sm:$0xff] }
  0x3a   :  { %2101 = vmatpush1.bf16.msra.mxu1 %v2934_v62  ;;  %v111_v23 = vld [vmem:[#allocation7 + $0x1b8] sm:$0xff]  ;;  %v116_v29 = vld [vmem:[#allocation7 + $0x1e0] sm:$0xff]  ;;  %v2958_v31 = vpack.c.bf16 %v102_v20, %v98_v19  ;;  %v106_v34 = vld [vmem:[#allocation7 + $0x190] sm:$0xff] }
  0x3b   :  { %2103 = vmatprep.subr.bf16.mxu1 %v2937_v1  ;;  %v2961_v32 = vpack.c.bf16 %v111_v23, %v107_v21  ;;  %v110_v35 = vld [vmem:[#allocation7 + $0x1b0] sm:$0xff]  ;;  %v115_v36 = vld [vmem:[#allocation7 + $0x1d8] sm:$0xff]  ;;  %v2964_v39 = vpack.c.bf16 %v116_v29, %v112_v28  ;;  %v52_v49 = vld [vmem:[#allocation4] sm:$0xff] }
  0x3c   :  { %2073 = vmatpush1.bf16.msra.mxu0 %v2928_v55  ;;  %v119_v38 = vld [vmem:[#allocation7 + $0x1f8] sm:$0xff]  ;;  %v2968_v40 = vpack.c.bf16 %v110_v35, %v106_v34  ;;  %v114_v43 = vld [vmem:[#allocation7 + $0x1d0] sm:$0xff]  ;;  %v53_v50 = vld [vmem:[#allocation4 + $0x8] sm:$0xff] }
  0x3d   :  { %2075 = vmatprep.subr.bf16.mxu0 %v2931_v58  ;;  %v2971_v41 = vpack.c.bf16 %v119_v38, %v115_v36  ;;  %v118_v44 = vld [vmem:[#allocation7 + $0x1f0] sm:$0xff]  ;;  %v55_v60 = vld [vmem:[#allocation4 + $0x18] sm:$0xff] }
  0x3e   :  { %2105 = vmatpush1.bf16.msra.mxu1 %v2946_v15  ;;  %v2975_v47 = vpack.c.bf16 %v118_v44, %v114_v43  ;;  %v54_v3 = vld [vmem:[#allocation4 + $0x10] sm:$0xff] }
  0x3f   :  { %2107 = vmatprep.subr.bf16.mxu1 %v2949_v18 }
  0x40   :  { %2077 = vmatpush1.bf16.msra.mxu0 %v2940_v7 }
  0x41   :  { %2079 = vmatprep.subr.bf16.mxu0 %v2943_v10 }
  0x42   :  { %2109 = vmatpush1.bf16.msra.mxu1 %v2958_v31 }
  0x43   :  { %2111 = vmatprep.subr.bf16.mxu1 %v2961_v32 }
  0x44   :  { %2081 = vmatpush1.bf16.msra.mxu0 %v2952_v24 }
  0x45   :  { %2083 = vmatprep.subr.bf16.mxu0 %v2955_v27 }
  0x46   :  { %2113 = vmatpush1.bf16.msra.mxu1 %v2968_v40 }
  0x47   :  { %2115 = vmatprep.subr.bf16.mxu1 %v2971_v41 }
  0x48   :  { %2085 = vmatpush1.bf16.msra.mxu0 %v2964_v39 }
  0x49   :  { %2119 = vmatprep.subr.bf16.mxu0 %v2883_v4 }
  0x4a   :  { %2117 = vmatpush1.bf16.msra.mxu1 %v2975_v47 }
  0x4b   :  { %185 = vmatmul.mubr.f32.vlgmr.msra.gmra.mrb[0].mxu0 %v2826_v0  ;;  %2151 = vmatprep.subr.bf16.mxu1 %v2896_v22 }
  0x4c   :  { %2121 = vmatpush1.bf16.msra.mxu0 %v2885_v8  ;;  %424 = vmatprep.mubr.f32.mxu0 %v2826_v0 }
  0x4d   :  { %2123 = vmatprep.subr.bf16.mxu0 %v2887_v9  ;;  %256 = vmatmul.mubr.f32.vlgmr.msra.gmra.mrb[0].mxu1 %v2826_v0 }
  0x4e   :  { %2153 = vmatpush1.bf16.msra.mxu1 %v2898_v25  ;;  %495 = vmatprep.mubr.f32.mxu1 %v2826_v0 }
  0x4f   :  { %2155 = vmatprep.subr.bf16.mxu1 %v2908_v33 }
  0x50   :  { %2125 = vmatpush1.bf16.msra.mxu0 %v2891_v14 }
  0x51   :  { %2127 = vmatprep.subr.bf16.mxu0 %v2894_v17 }
  0x52   :  { %2157 = vmatpush1.bf16.msra.mxu1 %v2910_v37 }
  0x53   :  { %2159 = vmatprep.subr.bf16.mxu1 %v2916_v45 }
  0x54   :  { %2129 = vmatpush1.bf16.msra.mxu0 %v2901_v26 }
  0x55   :  { %2131 = vmatprep.subr.bf16.mxu0 %v2905_v30 }
  0x56   :  { %2161 = vmatpush1.bf16.msra.mxu1 %v2922_v48 }
  0x57   :  { %2163 = vmatprep.subr.bf16.mxu1 %v2925_v52 }
  0x58   :  { %2133 = vmatpush1.bf16.msra.mxu0 %v2914_v42 }
  0x59   :  { %2135 = vmatprep.subr.bf16.mxu0 %v2919_v46 }
  0x5a   :  { %2165 = vmatpush1.bf16.msra.mxu1 %v2934_v62 }
  0x5b   :  { %2167 = vmatprep.subr.bf16.mxu1 %v2937_v1 }
  0x5c   :  { %2137 = vmatpush1.bf16.msra.mxu0 %v2928_v55 }
  0x5d   :  { %2139 = vmatprep.subr.bf16.mxu0 %v2931_v58 }
  0x5e   :  { %2169 = vmatpush1.bf16.msra.mxu1 %v2946_v15 }
  0x5f   :  { %2171 = vmatprep.subr.bf16.mxu1 %v2949_v18 }
  0x60   :  { %2141 = vmatpush1.bf16.msra.mxu0 %v2940_v7 }
  0x61   :  { %2143 = vmatprep.subr.bf16.mxu0 %v2943_v10 }
  0x62   :  { %2173 = vmatpush1.bf16.msra.mxu1 %v2958_v31 }
  0x63   :  { %2175 = vmatprep.subr.bf16.mxu1 %v2961_v32 }
  0x64   :  { %2145 = vmatpush1.bf16.msra.mxu0 %v2952_v24 }
  0x65   :  { %2147 = vmatprep.subr.bf16.mxu0 %v2955_v27 }
  0x66   :  { %2177 = vmatpush1.bf16.msra.mxu1 %v2968_v40 }
  0x67   :  { %2179 = vmatprep.subr.bf16.mxu1 %v2971_v41 }
  0x68   :  { %2149 = vmatpush1.bf16.msra.mxu0 %v2964_v39 }
  0x69   :  { %2183 = vmatprep.subr.bf16.mxu0 %v2883_v4 }
  0x6a   :  { %2181 = vmatpush1.bf16.msra.mxu1 %v2975_v47 }
  0x6b   :  { %2215 = vmatprep.subr.bf16.mxu1 %v2896_v22 }
 0x11e   :  { %v186_v51 = vpop.f32.mrb[0].mxu0 }
 0x11f   :  { %v262_v53 = vadd.f32 %v186_v51, %v52_v49  ;;  %v188_v54 = vpop.f32.mrb[1].mxu0 }
 0x120   :  { %v263_v56 = vadd.f32 %v188_v54, %v53_v50  ;;  %v257_v61 = vpop.f32.mrb[0].mxu1 }
 0x121   :  { %v2030_v57 = vmul.f32 -1.442695, %v262_v53  ;;  %v259_v63 = vpop.f32.mrb[1].mxu1  ;;  %v264_v6 = vadd.f32 %v257_v61, %v54_v3 }
 0x122   :  { %v2031_v59 = vmul.f32 -1.442695, %v263_v56  ;;  %v265_v2 = vadd.f32 %v259_v63, %v55_v60  ;;  %v295_v56 = vld [vmem:[#allocation4 + $0x38] sm:$0xff] }
 0x123   :  { %2576 = vpow2.f32 %v2030_v57  ;;  %v294_v57 = vld [vmem:[#allocation4 + $0x30] sm:$0xff] }
 0x124   :  { %2578 = vpow2.f32 %v2031_v59  ;;  %v2032_v5 = vmul.f32 -1.442695, %v265_v2 }
 0x126   :  { %2580 = vpow2.f32 %v2032_v5 }
 0x127   :  { %2582 = vtanh.f32 %v264_v6 }
 0x12d   :  { %v2577_v11 = vpop.eup %2576 }
 0x12e   :  { %v2579_v12 = vpop.eup %2578  ;;  %v269_v13 = vadd.f32 1.0, %v2577_v11 }
 0x12f   :  { %v275_v16 = vadd.f32 1.0, %v2579_v12 }
 0x130   :  { %2584 = vrcp.f32 %v269_v13  ;;  %v2581_v19 = vpop.eup %2580 }
 0x131   :  { %2586 = vrcp.f32 %v275_v16  ;;  %v2583_v20 = vpop.eup %2582  ;;  %v282_v23 = vadd.f32 1.0, %v2581_v19 }
 0x133   :  { %2588 = vrcp.f32 %v282_v23 }
 0x13a   :  { %v2585_v21 = vpop.eup %2584 }
 0x13b   :  { %v2587_v28 = vpop.eup %2586  ;;  %v286_v29 = vmul.f32 %v2585_v21, %v2583_v20 }
 0x13c   :  { %v285_v34 = vmul.f32 0.0, %v2587_v28  ;;  %v536_v28 = vld [vmem:[#allocation4 + $0x58] sm:$0xff] }
 0x13d   :  { %v2589_v36 = vpop.eup %2588 }
 0x13e   :  { %v3017_v35 = vadd.f32 %v286_v29, %v285_v34  ;;  %v535_v34 = vld [vmem:[#allocation4 + $0x50] sm:$0xff] }
 0x140   :  { %2590 = vtanh.f32 %v3017_v35 }
 0x14a   :  { %v2591_v38 = vpop.eup %2590 }
 0x14b   :  { %v289_v43 = vmul.f32 %v2591_v38, %v2589_v36 }
 0x14d   :  { %290 = vst [vmem:[#allocation9] sm:$0xff] %v289_v43  ;;  %425 = vmatmul.mubr.f32.vlgmr.msra.gmra.mrb[2].mxu0 %v289_v43  ;;  %496 = vmatmul.mubr.f32.vlgmr.msra.gmra.mrb[2].mxu1 %v289_v43 }
 0x14e   :  { %2185 = vmatpush1.bf16.msra.mxu0 %v2885_v8  ;;  %2217 = vmatpush1.bf16.msra.mxu1 %v2898_v25 }
 0x14f   :  { %2187 = vmatprep.subr.bf16.mxu0 %v2887_v9  ;;  %2219 = vmatprep.subr.bf16.mxu1 %v2908_v33 }
 0x150   :  { %665 = vmatprep.mubr.f32.mxu0 %v2826_v0  ;;  %736 = vmatprep.mubr.f32.mxu1 %v2826_v0 }
 0x152   :  { %2189 = vmatpush1.bf16.msra.mxu0 %v2891_v14  ;;  %2221 = vmatpush1.bf16.msra.mxu1 %v2910_v37 }
 0x153   :  { %2191 = vmatprep.subr.bf16.mxu0 %v2894_v17  ;;  %2223 = vmatprep.subr.bf16.mxu1 %v2916_v45 }
 0x156   :  { %2193 = vmatpush1.bf16.msra.mxu0 %v2901_v26  ;;  %2225 = vmatpush1.bf16.msra.mxu1 %v2922_v48 }
 0x157   :  { %2195 = vmatprep.subr.bf16.mxu0 %v2905_v30  ;;  %2227 = vmatprep.subr.bf16.mxu1 %v2925_v52 }
 0x15a   :  { %2197 = vmatpush1.bf16.msra.mxu0 %v2914_v42  ;;  %2229 = vmatpush1.bf16.msra.mxu1 %v2934_v62  ;;  %v292_v42 = vld [vmem:[#allocation4 + $0x20] sm:$0xff] }
 0x15b   :  { %2199 = vmatprep.subr.bf16.mxu0 %v2919_v46  ;;  %2231 = vmatprep.subr.bf16.mxu1 %v2937_v1 }
 0x15e   :  { %2201 = vmatpush1.bf16.msra.mxu0 %v2928_v55  ;;  %2233 = vmatpush1.bf16.msra.mxu1 %v2946_v15  ;;  %v293_v55 = vld [vmem:[#allocation4 + $0x28] sm:$0xff] }
 0x15f   :  { %2203 = vmatprep.subr.bf16.mxu0 %v2931_v58  ;;  %2235 = vmatprep.subr.bf16.mxu1 %v2949_v18 }
 0x162   :  { %2205 = vmatpush1.bf16.msra.mxu0 %v2940_v7  ;;  %2237 = vmatpush1.bf16.msra.mxu1 %v2958_v31 }
 0x163   :  { %2207 = vmatprep.subr.bf16.mxu0 %v2943_v10  ;;  %2239 = vmatprep.subr.bf16.mxu1 %v2961_v32 }
 0x166   :  { %2209 = vmatpush1.bf16.msra.mxu0 %v2952_v24  ;;  %2241 = vmatpush1.bf16.msra.mxu1 %v2968_v40 }
 0x167   :  { %2211 = vmatprep.subr.bf16.mxu0 %v2955_v27  ;;  %2243 = vmatprep.subr.bf16.mxu1 %v2971_v41 }
 0x16a   :  { %2213 = vmatpush1.bf16.msra.mxu0 %v2964_v39  ;;  %2245 = vmatpush1.bf16.msra.mxu1 %v2975_v47 }
 0x16b   :  { %2247 = vmatprep.subr.bf16.mxu0 %v2883_v4  ;;  %2279 = vmatprep.subr.bf16.mxu1 %v2896_v22 }
 0x220   :  { %v426_v7 = vpop.f32.mrb[2].mxu0  ;;  %v497_v44 = vpop.f32.mrb[2].mxu1 }
 0x221   :  { %v502_v49 = vadd.f32 %v426_v7, %v292_v42  ;;  %v428_v24 = vpop.f32.mrb[3].mxu0  ;;  %v499_v50 = vpop.f32.mrb[3].mxu1  ;;  %v504_v60 = vadd.f32 %v497_v44, %v294_v57  ;;  %v1020_v57 = vld [vmem:[#allocation7 + $0x8] sm:$0xff] }
 0x222   :  { %v503_v51 = vadd.f32 %v428_v24, %v293_v55  ;;  %v505_v39 = vadd.f32 %v499_v50, %v295_v56 }
 0x223   :  { %v2033_v53 = vmul.f32 -1.442695, %v502_v49 }
 0x224   :  { %v2034_v54 = vmul.f32 -1.442695, %v503_v51  ;;  %v2035_v59 = vmul.f32 -1.442695, %v505_v39 }
 0x225   :  { %2592 = vpow2.f32 %v2033_v53 }
 0x226   :  { %2594 = vpow2.f32 %v2034_v54 }
 0x227   :  { %2596 = vpow2.f32 %v2035_v59  ;;  %v1024_v59 = vld [vmem:[#allocation7 + $0x28] sm:$0xff] }
 0x228   :  { %2598 = vtanh.f32 %v504_v60  ;;  %v1022_v60 = vld [vmem:[#allocation7 + $0x18] sm:$0xff] }
 0x22f   :  { %v2593_v4 = vpop.eup %2592 }
 0x230   :  { %v2595_v61 = vpop.eup %2594  ;;  %v509_v22 = vadd.f32 1.0, %v2593_v4  ;;  %v3106_v4 = vpack.c.bf16 %v1024_v59, %v1020_v57  ;;  %v1066_v59 = vld [vmem:[#allocation7 + $0x178] sm:$0xff] }
 0x231   :  { %v515_v63 = vadd.f32 1.0, %v2595_v61  ;;  %v2597_v2 = vpop.eup %2596  ;;  %v1026_v61 = vld [vmem:[#allocation7 + $0x38] sm:$0xff] }
 0x232   :  { %2600 = vrcp.f32 %v509_v22  ;;  %v2599_v3 = vpop.eup %2598  ;;  %v522_v12 = vadd.f32 1.0, %v2597_v2  ;;  %v1019_v22 = vld [vmem:[#allocation7] sm:$0xff]  ;;  %v3108_v2 = vpack.c.bf16 %v1026_v61, %v1022_v60  ;;  %v1061_v60 = vld [vmem:[#allocation7 + $0x150] sm:$0xff] }
 0x233   :  { %2602 = vrcp.f32 %v515_v63  ;;  %v1023_v63 = vld [vmem:[#allocation7 + $0x20] sm:$0xff]  ;;  %v1065_v61 = vld [vmem:[#allocation7 + $0x170] sm:$0xff] }
 0x234   :  { %2604 = vrcp.f32 %v522_v12  ;;  %v1028_v12 = vld [vmem:[#allocation7 + $0x48] sm:$0xff] }
 0x23c   :  { %v2601_v5 = vpop.eup %2600 }
 0x23d   :  { %v2603_v6 = vpop.eup %2602  ;;  %v526_v11 = vmul.f32 %v2601_v5, %v2599_v3  ;;  %v3110_v3 = vpack.c.bf16 %v1023_v63, %v1019_v22  ;;  %v1021_v5 = vld [vmem:[#allocation7 + $0x10] sm:$0xff]  ;;  %v3166_v63 = vpack.c.bf16 %v1065_v61, %v1061_v60 }
 0x23e   :  { %v525_v13 = vmul.f32 %v2603_v6, %v3017_v35  ;;  %v2605_v19 = vpop.eup %2604  ;;  %v1025_v6 = vld [vmem:[#allocation7 + $0x30] sm:$0xff] }
 0x240   :  { %v3055_v16 = vadd.f32 %v526_v11, %v525_v13  ;;  %v3113_v11 = vpack.c.bf16 %v1025_v6, %v1021_v5  ;;  %v1032_v13 = vld [vmem:[#allocation7 + $0x68] sm:$0xff] }
 0x241   :  { %v1068_v5 = vld [vmem:[#allocation7 + $0x188] sm:$0xff] }
 0x242   :  { %2606 = vtanh.f32 %v3055_v16  ;;  %v1072_v6 = vld [vmem:[#allocation7 + $0x1a8] sm:$0xff] }
 0x24c   :  { %v2607_v20 = vpop.eup %2606 }
 0x24d   :  { %v529_v21 = vmul.f32 %v2607_v20, %v2605_v19  ;;  %v3118_v19 = vpack.c.bf16 %v1032_v13, %v1028_v12  ;;  %v1034_v20 = vld [vmem:[#allocation7 + $0x78] sm:$0xff]  ;;  %v3169_v13 = vpack.c.bf16 %v1072_v6, %v1068_v5 }
 0x24e   :  { %v1070_v12 = vld [vmem:[#allocation7 + $0x198] sm:$0xff] }
 0x24f   :  { %531 = vst [vmem:[#allocation9 + $0x8] sm:$0xff] %v529_v21  ;;  %666 = vmatmul.mubr.f32.vlgmr.msra.gmra.mrb[4].mxu0 %v529_v21  ;;  %737 = vmatmul.mubr.f32.vlgmr.msra.gmra.mrb[4].mxu1 %v529_v21  ;;  %v1027_v21 = vld [vmem:[#allocation7 + $0x40] sm:$0xff] }
 0x250   :  { %2249 = vmatpush1.bf16.msra.mxu0 %v2885_v8  ;;  %2281 = vmatpush1.bf16.msra.mxu1 %v2898_v25  ;;  %v802_v8 = vld [vmem:[#allocation7 + $0xc0] sm:$0xff] }
 0x251   :  { %2251 = vmatprep.subr.bf16.mxu0 %v2887_v9  ;;  %2283 = vmatprep.subr.bf16.mxu1 %v2908_v33  ;;  %v806_v9 = vld [vmem:[#allocation7 + $0xe0] sm:$0xff] }
 0x252   :  { %906 = vmatprep.mubr.f32.mxu0 %v2826_v0  ;;  %977 = vmatprep.mubr.f32.mxu1 %v2826_v0  ;;  %v814_v25 = vld [vmem:[#allocation7 + $0x120] sm:$0xff] }
 0x253   :  { %v822_v33 = vld [vmem:[#allocation7 + $0x160] sm:$0xff] }
 0x254   :  { %2253 = vmatpush1.bf16.msra.mxu0 %v2891_v14  ;;  %2285 = vmatpush1.bf16.msra.mxu1 %v2910_v37  ;;  %v3081_v14 = vpack.c.bf16 %v806_v9, %v802_v8  ;;  %v1031_v8 = vld [vmem:[#allocation7 + $0x60] sm:$0xff] }
 0x255   :  { %2255 = vmatprep.subr.bf16.mxu0 %v2894_v17  ;;  %2287 = vmatprep.subr.bf16.mxu1 %v2916_v45  ;;  %v810_v17 = vld [vmem:[#allocation7 + $0x100] sm:$0xff] }
 0x256   :  { %v826_v45 = vld [vmem:[#allocation7 + $0x180] sm:$0xff] }
 0x258   :  { %2257 = vmatpush1.bf16.msra.mxu0 %v2901_v26  ;;  %2289 = vmatpush1.bf16.msra.mxu1 %v2922_v48  ;;  %v3085_v26 = vpack.c.bf16 %v814_v25, %v810_v17  ;;  %v830_v48 = vld [vmem:[#allocation7 + $0x1a0] sm:$0xff]  ;;  %v3122_v17 = vpack.c.bf16 %v1031_v8, %v1027_v21  ;;  %v1029_v25 = vld [vmem:[#allocation7 + $0x50] sm:$0xff] }
 0x259   :  { %2259 = vmatprep.subr.bf16.mxu0 %v2905_v30  ;;  %2291 = vmatprep.subr.bf16.mxu1 %v2925_v52  ;;  %v818_v30 = vld [vmem:[#allocation7 + $0x140] sm:$0xff]  ;;  %v3092_v52 = vpack.c.bf16 %v830_v48, %v826_v45  ;;  %v1036_v45 = vld [vmem:[#allocation7 + $0x88] sm:$0xff]  ;;  %v1073_v21 = vld [vmem:[#allocation7 + $0x1b0] sm:$0xff] }
 0x25a   :  { %v3088_v37 = vpack.c.bf16 %v822_v33, %v818_v30  ;;  %v1033_v30 = vld [vmem:[#allocation7 + $0x70] sm:$0xff]  ;;  %v1040_v48 = vld [vmem:[#allocation7 + $0xa8] sm:$0xff] }
 0x25b   :  { %v3125_v33 = vpack.c.bf16 %v1033_v30, %v1029_v25  ;;  %v1076_v25 = vld [vmem:[#allocation7 + $0x1c8] sm:$0xff] }
 0x25c   :  { %2293 = vmatpush1.bf16.msra.mxu1 %v2934_v62  ;;  %2261 = vmatpush1.bf16.msra.mxu0 %v3081_v14  ;;  %v838_v62 = vld [vmem:[#allocation7 + $0x1e0] sm:$0xff]  ;;  %v1080_v30 = vld [vmem:[#allocation7 + $0x1e8] sm:$0xff] }
 0x25d   :  { %2295 = vmatprep.subr.bf16.mxu1 %v2937_v1  ;;  %2263 = vmatprep.subr.bf16.mxu0 %v2919_v46  ;;  %v834_v46 = vld [vmem:[#allocation7 + $0x1c0] sm:$0xff] }
 0x25e   :  { %v3096_v1 = vpack.c.bf16 %v838_v62, %v834_v46  ;;  %v1038_v46 = vld [vmem:[#allocation7 + $0x98] sm:$0xff]  ;;  %v3130_v62 = vpack.c.bf16 %v1040_v48, %v1036_v45 }
 0x25f   :  { %v1078_v45 = vld [vmem:[#allocation7 + $0x1d8] sm:$0xff] }
 0x260   :  { %2297 = vmatpush1.bf16.msra.mxu1 %v2946_v15  ;;  %2265 = vmatpush1.bf16.msra.mxu0 %v3085_v26  ;;  %v533_v15 = vld [vmem:[#allocation4 + $0x40] sm:$0xff]  ;;  %v1082_v48 = vld [vmem:[#allocation7 + $0x1f8] sm:$0xff] }
 0x261   :  { %2299 = vmatprep.subr.bf16.mxu1 %v2949_v18  ;;  %2267 = vmatprep.subr.bf16.mxu0 %v2931_v58  ;;  %v534_v58 = vld [vmem:[#allocation4 + $0x48] sm:$0xff] }
 0x264   :  { %2301 = vmatpush1.bf16.msra.mxu1 %v2958_v31  ;;  %2269 = vmatpush1.bf16.msra.mxu0 %v3088_v37 }
 0x265   :  { %2303 = vmatprep.subr.bf16.mxu1 %v2961_v32  ;;  %2271 = vmatprep.subr.bf16.mxu0 %v2943_v10 }
 0x268   :  { %2305 = vmatpush1.bf16.msra.mxu1 %v2968_v40  ;;  %2273 = vmatpush1.bf16.msra.mxu0 %v3092_v52 }
 0x269   :  { %2307 = vmatprep.subr.bf16.mxu1 %v2971_v41  ;;  %2275 = vmatprep.subr.bf16.mxu0 %v2955_v27 }
 0x26c   :  { %2309 = vmatpush1.bf16.msra.mxu1 %v2975_v47  ;;  %2277 = vmatpush1.bf16.msra.mxu0 %v3096_v1 }
 0x26d   :  { %2311 = vmatprep.subr.bf16.mxu0 %v3106_v4  ;;  %2343 = vmatprep.subr.bf16.mxu1 %v3108_v2 }
 0x322   :  { %v667_v18 = vpop.f32.mrb[4].mxu0  ;;  %v738_v31 = vpop.f32.mrb[4].mxu1 }
 0x323   :  { %v743_v32 = vadd.f32 %v667_v18, %v533_v15  ;;  %v669_v40 = vpop.f32.mrb[5].mxu0  ;;  %v740_v41 = vpop.f32.mrb[5].mxu1  ;;  %v745_v36 = vadd.f32 %v738_v31, %v535_v34  ;;  %v1042_v15 = vld [vmem:[#allocation7 + $0xb8] sm:$0xff]  ;;  %v1039_v18 = vld [vmem:[#allocation7 + $0xa0] sm:$0xff] }
 0x324   :  { %v744_v47 = vadd.f32 %v669_v40, %v534_v58  ;;  %v746_v29 = vadd.f32 %v740_v41, %v536_v28  ;;  %v1035_v58 = vld [vmem:[#allocation7 + $0x80] sm:$0xff]  ;;  %v3132_v31 = vpack.c.bf16 %v1042_v15, %v1038_v46  ;;  %v1037_v40 = vld [vmem:[#allocation7 + $0x90] sm:$0xff]  ;;  %v1046_v28 = vld [vmem:[#allocation7 + $0xd8] sm:$0xff]  ;;  %v3179_v15 = vpack.c.bf16 %v1080_v30, %v1076_v25 }
 0x325   :  { %v2036_v23 = vmul.f32 -1.442695, %v743_v32  ;;  %v3134_v32 = vpack.c.bf16 %v1039_v18, %v1035_v58  ;;  %v1041_v41 = vld [vmem:[#allocation7 + $0xb0] sm:$0xff]  ;;  %v1050_v34 = vld [vmem:[#allocation7 + $0xf8] sm:$0xff]  ;;  %v3182_v58 = vpack.c.bf16 %v1082_v48, %v1078_v45 }
 0x326   :  { %v2037_v10 = vmul.f32 -1.442695, %v744_v47  ;;  %v2038_v35 = vmul.f32 -1.442695, %v746_v29  ;;  %v3137_v47 = vpack.c.bf16 %v1041_v41, %v1037_v40  ;;  %v1077_v18 = vld [vmem:[#allocation7 + $0x1d0] sm:$0xff] }
 0x327   :  { %2608 = vpow2.f32 %v2036_v23  ;;  %v1044_v23 = vld [vmem:[#allocation7 + $0xc8] sm:$0xff]  ;;  %v1081_v40 = vld [vmem:[#allocation7 + $0x1f0] sm:$0xff] }
 0x328   :  { %2610 = vpow2.f32 %v2037_v10  ;;  %v1048_v10 = vld [vmem:[#allocation7 + $0xe8] sm:$0xff]  ;;  %v3187_v41 = vpack.c.bf16 %v1081_v40, %v1077_v18 }
 0x329   :  { %2612 = vpow2.f32 %v2038_v35  ;;  %v3142_v29 = vpack.c.bf16 %v1048_v10, %v1044_v23  ;;  %v1045_v35 = vld [vmem:[#allocation7 + $0xd0] sm:$0xff]  ;;  %v774_v23 = vld [vmem:[#allocation4 + $0x60] sm:$0xff]  ;;  %v775_v10 = vld [vmem:[#allocation4 + $0x68] sm:$0xff] }
 0x32a   :  { %2614 = vtanh.f32 %v745_v36  ;;  %v1049_v36 = vld [vmem:[#allocation7 + $0xf0] sm:$0xff] }
 0x331   :  { %v2609_v27 = vpop.eup %2608 }
 0x332   :  { %v2611_v38 = vpop.eup %2610  ;;  %v750_v43 = vadd.f32 1.0, %v2609_v27  ;;  %v3144_v27 = vpack.c.bf16 %v1050_v34, %v1046_v28 }
 0x333   :  { %v756_v42 = vadd.f32 1.0, %v2611_v38  ;;  %v2613_v55 = vpop.eup %2612  ;;  %v3146_v38 = vpack.c.bf16 %v1049_v36, %v1045_v35 }
 0x334   :  { %2616 = vrcp.f32 %v750_v43  ;;  %v2615_v7 = vpop.eup %2614  ;;  %v763_v50 = vadd.f32 1.0, %v2613_v55  ;;  %v1052_v43 = vld [vmem:[#allocation7 + $0x108] sm:$0xff]  ;;  %v1054_v55 = vld [vmem:[#allocation7 + $0x118] sm:$0xff] }
 0x335   :  { %2618 = vrcp.f32 %v756_v42  ;;  %v1056_v42 = vld [vmem:[#allocation7 + $0x128] sm:$0xff] }
 0x336   :  { %2620 = vrcp.f32 %v763_v50 }
 0x33e   :  { %v2617_v44 = vpop.eup %2616 }
 0x33f   :  { %v2619_v49 = vpop.eup %2618  ;;  %v767_v24 = vmul.f32 %v2617_v44, %v2615_v7  ;;  %v3152_v7 = vpack.c.bf16 %v1056_v42, %v1052_v43  ;;  %v1058_v44 = vld [vmem:[#allocation7 + $0x138] sm:$0xff] }
 0x340   :  { %v766_v51 = vmul.f32 %v2619_v49, %v3055_v16  ;;  %v2621_v54 = vpop.eup %2620  ;;  %v1030_v16 = vld [vmem:[#allocation7 + $0x58] sm:$0xff]  ;;  %v1053_v49 = vld [vmem:[#allocation7 + $0x110] sm:$0xff]  ;;  %v3154_v50 = vpack.c.bf16 %v1058_v44, %v1054_v55 }
 0x341   :  { %v3120_v9 = vpack.c.bf16 %v1034_v20, %v1030_v16  ;;  %v1074_v16 = vld [vmem:[#allocation7 + $0x1b8] sm:$0xff]  ;;  %v1069_v20 = vld [vmem:[#allocation7 + $0x190] sm:$0xff] }
 0x342   :  { %v3101_v53 = vadd.f32 %v767_v24, %v766_v51  ;;  %v1057_v24 = vld [vmem:[#allocation7 + $0x130] sm:$0xff]  ;;  %v3172_v8 = vpack.c.bf16 %v1074_v16, %v1070_v12  ;;  %v3177_v46 = vpack.c.bf16 %v1073_v21, %v1069_v20 }
 0x343   :  { %v3156_v51 = vpack.c.bf16 %v1057_v24, %v1053_v49  ;;  %v777_v49 = vld [vmem:[#allocation4 + $0x78] sm:$0xff] }
 0x344   :  { %2622 = vtanh.f32 %v3101_v53 }
 0x34e   :  { %v2623_v56 = vpop.eup %2622 }
 0x34f   :  { %v770_v39 = vmul.f32 %v2623_v56, %v2621_v54  ;;  %v1060_v54 = vld [vmem:[#allocation7 + $0x148] sm:$0xff] }
 0x350   :  { %v1064_v56 = vld [vmem:[#allocation7 + $0x168] sm:$0xff] }
 0x351   :  { %772 = vst [vmem:[#allocation9 + $0x10] sm:$0xff] %v770_v39  ;;  %907 = vmatmul.mubr.f32.vlgmr.msra.gmra.mrb[6].mxu0 %v770_v39  ;;  %978 = vmatmul.mubr.f32.vlgmr.msra.gmra.mrb[6].mxu1 %v770_v39  ;;  %v1062_v39 = vld [vmem:[#allocation7 + $0x158] sm:$0xff]  ;;  %v3161_v57 = vpack.c.bf16 %v1064_v56, %v1060_v54  ;;  %v776_v54 = vld [vmem:[#allocation4 + $0x70] sm:$0xff] }
 0x352   :  { %1147 = vmatprep.mubr.f32.mxu0 %v2826_v0  ;;  %1218 = vmatprep.mubr.f32.mxu1 %v2826_v0  ;;  %v3164_v22 = vpack.c.bf16 %v1066_v59, %v1062_v39 }
 0x353   :  { %2313 = vmatpush1.bf16.msra.mxu0 %v3110_v3  ;;  %2345 = vmatpush1.bf16.msra.mxu1 %v3113_v11 }
 0x354   :  { %2315 = vmatprep.subr.bf16.mxu0 %v3118_v19  ;;  %2347 = vmatprep.subr.bf16.mxu1 %v3120_v9 }
 0x357   :  { %2317 = vmatpush1.bf16.msra.mxu0 %v3122_v17  ;;  %2349 = vmatpush1.bf16.msra.mxu1 %v3125_v33 }
 0x358   :  { %2319 = vmatprep.subr.bf16.mxu0 %v3130_v62  ;;  %2351 = vmatprep.subr.bf16.mxu1 %v3132_v31 }
 0x35b   :  { %2321 = vmatpush1.bf16.msra.mxu0 %v3134_v32  ;;  %2353 = vmatpush1.bf16.msra.mxu1 %v3137_v47 }
 0x35c   :  { %2323 = vmatprep.subr.bf16.mxu0 %v3142_v29  ;;  %2355 = vmatprep.subr.bf16.mxu1 %v3144_v27 }
 0x35f   :  { %2325 = vmatpush1.bf16.msra.mxu0 %v3081_v14  ;;  %2357 = vmatpush1.bf16.msra.mxu1 %v3146_v38 }
 0x360   :  { %2327 = vmatprep.subr.bf16.mxu0 %v3152_v7  ;;  %2359 = vmatprep.subr.bf16.mxu1 %v3154_v50 }
 0x363   :  { %2329 = vmatpush1.bf16.msra.mxu0 %v3085_v26  ;;  %2361 = vmatpush1.bf16.msra.mxu1 %v3156_v51 }
 0x364   :  { %2331 = vmatprep.subr.bf16.mxu0 %v3161_v57  ;;  %2363 = vmatprep.subr.bf16.mxu1 %v3164_v22 }
 0x367   :  { %2333 = vmatpush1.bf16.msra.mxu0 %v3088_v37  ;;  %2365 = vmatpush1.bf16.msra.mxu1 %v3166_v63 }
 0x368   :  { %2335 = vmatprep.subr.bf16.mxu0 %v3169_v13  ;;  %2367 = vmatprep.subr.bf16.mxu1 %v3172_v8 }
 0x36b   :  { %2337 = vmatpush1.bf16.msra.mxu0 %v3092_v52  ;;  %2369 = vmatpush1.bf16.msra.mxu1 %v3177_v46 }
 0x36c   :  { %2339 = vmatprep.subr.bf16.mxu0 %v3179_v15  ;;  %2371 = vmatprep.subr.bf16.mxu1 %v3182_v58 }
 0x36f   :  { %2341 = vmatpush1.bf16.msra.mxu0 %v3096_v1  ;;  %2373 = vmatpush1.bf16.msra.mxu1 %v3187_v41 }
 0x370   :  { %2375 = vmatprep.subr.bf16.mxu0 %v3106_v4  ;;  %2407 = vmatprep.subr.bf16.mxu1 %v3108_v2 }
 0x424   :  { %v908_v28 = vpop.f32.mrb[6].mxu0  ;;  %v979_v34 = vpop.f32.mrb[6].mxu1 }
 0x425   :  { %v984_v35 = vadd.f32 %v908_v28, %v774_v23  ;;  %v910_v36 = vpop.f32.mrb[7].mxu0  ;;  %v981_v43 = vpop.f32.mrb[7].mxu1  ;;  %v986_v39 = vadd.f32 %v979_v34, %v776_v54  ;;  %v1016_v23 = vld [vmem:[#allocation4 + $0x88] sm:$0xff] }
 0x426   :  { %v985_v42 = vadd.f32 %v910_v36, %v775_v10  ;;  %v987_v24 = vadd.f32 %v981_v43, %v777_v49 }
 0x427   :  { %v2039_v55 = vmul.f32 -1.442695, %v984_v35 }
 0x428   :  { %v2040_v44 = vmul.f32 -1.442695, %v985_v42  ;;  %v2041_v56 = vmul.f32 -1.442695, %v987_v24  ;;  %v1017_v24 = vld [vmem:[#allocation4 + $0x90] sm:$0xff] }
 0x429   :  { %2624 = vpow2.f32 %v2039_v55 }
 0x42a   :  { %2626 = vpow2.f32 %v2040_v44  ;;  %v1018_v44 = vld [vmem:[#allocation4 + $0x98] sm:$0xff] }
 0x42b   :  { %2628 = vpow2.f32 %v2041_v56 }
 0x42c   :  { %2630 = vtanh.f32 %v986_v39 }
 0x433   :  { %v2625_v59 = vpop.eup %2624 }
 0x434   :  { %v2627_v60 = vpop.eup %2626  ;;  %v991_v61 = vadd.f32 1.0, %v2625_v59 }
 0x435   :  { %v997_v5 = vadd.f32 1.0, %v2627_v60  ;;  %v2629_v6 = vpop.eup %2628 }
 0x436   :  { %2632 = vrcp.f32 %v991_v61  ;;  %v2631_v12 = vpop.eup %2630  ;;  %v1004_v25 = vadd.f32 1.0, %v2629_v6 }
 0x437   :  { %2634 = vrcp.f32 %v997_v5 }
 0x438   :  { %2636 = vrcp.f32 %v1004_v25 }
 0x440   :  { %v2633_v16 = vpop.eup %2632 }
 0x441   :  { %v2635_v20 = vpop.eup %2634  ;;  %v1008_v21 = vmul.f32 %v2633_v16, %v2631_v12 }
 0x442   :  { %v1007_v30 = vmul.f32 %v2635_v20, %v3101_v53  ;;  %v2637_v48 = vpop.eup %2636  ;;  %v1015_v53 = vld [vmem:[#allocation4 + $0x80] sm:$0xff] }
 0x444   :  { %v3195_v45 = vadd.f32 %v1008_v21, %v1007_v30 }
 0x446   :  { %2638 = vtanh.f32 %v3195_v45 }
 0x450   :  { %v2639_v18 = vpop.eup %2638 }
 0x451   :  { %v1011_v40 = vmul.f32 %v2639_v18, %v2637_v48 }
 0x453   :  { %1013 = vst [vmem:[#allocation9 + $0x18] sm:$0xff] %v1011_v40  ;;  %1148 = vmatmul.mubr.f32.vlgmr.msra.gmra.mrb[8].mxu0 %v1011_v40  ;;  %1219 = vmatmul.mubr.f32.vlgmr.msra.gmra.mrb[8].mxu1 %v1011_v40 }
 0x454   :  { %2377 = vmatpush1.bf16.msra.mxu0 %v3110_v3  ;;  %2409 = vmatpush1.bf16.msra.mxu1 %v3113_v11 }
 0x455   :  { %2379 = vmatprep.subr.bf16.mxu0 %v3118_v19  ;;  %2411 = vmatprep.subr.bf16.mxu1 %v3120_v9 }
 0x456   :  { %1388 = vmatprep.mubr.f32.mxu0 %v2826_v0  ;;  %1459 = vmatprep.mubr.f32.mxu1 %v2826_v0 }
 0x458   :  { %2381 = vmatpush1.bf16.msra.mxu0 %v3122_v17  ;;  %2413 = vmatpush1.bf16.msra.mxu1 %v3125_v33 }
 0x459   :  { %2383 = vmatprep.subr.bf16.mxu0 %v3130_v62  ;;  %2415 = vmatprep.subr.bf16.mxu1 %v3132_v31 }
 0x45c   :  { %2385 = vmatpush1.bf16.msra.mxu0 %v3134_v32  ;;  %2417 = vmatpush1.bf16.msra.mxu1 %v3137_v47 }
 0x45d   :  { %2387 = vmatprep.subr.bf16.mxu0 %v3142_v29  ;;  %2419 = vmatprep.subr.bf16.mxu1 %v3144_v27 }
 0x460   :  { %2389 = vmatpush1.bf16.msra.mxu0 %v3081_v14  ;;  %2421 = vmatpush1.bf16.msra.mxu1 %v3146_v38 }
 0x461   :  { %2391 = vmatprep.subr.bf16.mxu0 %v3152_v7  ;;  %2423 = vmatprep.subr.bf16.mxu1 %v3154_v50 }
 0x464   :  { %2393 = vmatpush1.bf16.msra.mxu0 %v3085_v26  ;;  %2425 = vmatpush1.bf16.msra.mxu1 %v3156_v51 }
 0x465   :  { %2395 = vmatprep.subr.bf16.mxu0 %v3161_v57  ;;  %2427 = vmatprep.subr.bf16.mxu1 %v3164_v22 }
 0x468   :  { %2397 = vmatpush1.bf16.msra.mxu0 %v3088_v37  ;;  %2429 = vmatpush1.bf16.msra.mxu1 %v3166_v63 }
 0x469   :  { %2399 = vmatprep.subr.bf16.mxu0 %v3169_v13  ;;  %2431 = vmatprep.subr.bf16.mxu1 %v3172_v8 }
 0x46c   :  { %2401 = vmatpush1.bf16.msra.mxu0 %v3092_v52  ;;  %2433 = vmatpush1.bf16.msra.mxu1 %v3177_v46 }
 0x46d   :  { %2403 = vmatprep.subr.bf16.mxu0 %v3179_v15  ;;  %2435 = vmatprep.subr.bf16.mxu1 %v3182_v58 }
 0x470   :  { %2405 = vmatpush1.bf16.msra.mxu0 %v3096_v1  ;;  %2437 = vmatpush1.bf16.msra.mxu1 %v3187_v41 }
 0x471   :  { %2439 = vmatprep.subr.bf16.mxu0 %v3106_v4  ;;  %2471 = vmatprep.subr.bf16.mxu1 %v3108_v2 }
 0x526   :  { %v1149_v10 = vpop.f32.mrb[8].mxu0  ;;  %v1220_v28 = vpop.f32.mrb[8].mxu1 }
 0x527   :  { %v1225_v34 = vadd.f32 %v1149_v10, %v1015_v53  ;;  %v1151_v35 = vpop.f32.mrb[9].mxu0  ;;  %v1222_v36 = vpop.f32.mrb[9].mxu1  ;;  %v1227_v56 = vadd.f32 %v1220_v28, %v1017_v24 }
 0x528   :  { %v1226_v43 = vadd.f32 %v1151_v35, %v1016_v23  ;;  %v1228_v49 = vadd.f32 %v1222_v36, %v1018_v44  ;;  %v1259_v35 = vld [vmem:[#allocation4 + $0xb8] sm:$0xff]  ;;  %v1258_v36 = vld [vmem:[#allocation4 + $0xb0] sm:$0xff] }
 0x529   :  { %v2042_v42 = vmul.f32 -1.442695, %v1225_v34 }
 0x52a   :  { %v2043_v55 = vmul.f32 -1.442695, %v1226_v43  ;;  %v2044_v54 = vmul.f32 -1.442695, %v1228_v49 }
 0x52b   :  { %2640 = vpow2.f32 %v2042_v42 }
 0x52c   :  { %2642 = vpow2.f32 %v2043_v55 }
 0x52d   :  { %2644 = vpow2.f32 %v2044_v54 }
 0x52e   :  { %2646 = vtanh.f32 %v1227_v56 }
 0x535   :  { %v2641_v39 = vpop.eup %2640 }
 0x536   :  { %v2643_v59 = vpop.eup %2642  ;;  %v1232_v60 = vadd.f32 1.0, %v2641_v39 }
 0x537   :  { %v1238_v61 = vadd.f32 1.0, %v2643_v59  ;;  %v2645_v5 = vpop.eup %2644 }
 0x538   :  { %2648 = vrcp.f32 %v1232_v60  ;;  %v2647_v6 = vpop.eup %2646  ;;  %v1245_v21 = vadd.f32 1.0, %v2645_v5 }
 0x539   :  { %2650 = vrcp.f32 %v1238_v61 }
 0x53a   :  { %2652 = vrcp.f32 %v1245_v21  ;;  %v1499_v21 = vld [vmem:[#allocation4 + $0xd0] sm:$0xff] }
 0x542   :  { %v2649_v12 = vpop.eup %2648 }
 0x543   :  { %v2651_v16 = vpop.eup %2650  ;;  %v1249_v20 = vmul.f32 %v2649_v12, %v2647_v6 }
 0x544   :  { %v1248_v25 = vmul.f32 %v2651_v16, %v3195_v45  ;;  %v2653_v48 = vpop.eup %2652 }
 0x546   :  { %v3233_v30 = vadd.f32 %v1249_v20, %v1248_v25  ;;  %v1500_v20 = vld [vmem:[#allocation4 + $0xd8] sm:$0xff] }
 0x548   :  { %2654 = vtanh.f32 %v3233_v30 }
 0x552   :  { %v2655_v18 = vpop.eup %2654 }
 0x553   :  { %v1252_v40 = vmul.f32 %v2655_v18, %v2653_v48 }
 0x555   :  { %1254 = vst [vmem:[#allocation9 + $0x20] sm:$0xff] %v1252_v40  ;;  %1389 = vmatmul.mubr.f32.vlgmr.msra.gmra.mrb[10].mxu0 %v1252_v40  ;;  %1460 = vmatmul.mubr.f32.vlgmr.msra.gmra.mrb[10].mxu1 %v1252_v40 }
 0x556   :  { %2441 = vmatpush1.bf16.msra.mxu0 %v3110_v3  ;;  %2473 = vmatpush1.bf16.msra.mxu1 %v3113_v11 }
 0x557   :  { %2443 = vmatprep.subr.bf16.mxu0 %v3118_v19  ;;  %2475 = vmatprep.subr.bf16.mxu1 %v3120_v9 }
 0x558   :  { %1629 = vmatprep.mubr.f32.mxu0 %v2826_v0  ;;  %1700 = vmatprep.mubr.f32.mxu1 %v2826_v0 }
 0x55a   :  { %2445 = vmatpush1.bf16.msra.mxu0 %v3122_v17  ;;  %2477 = vmatpush1.bf16.msra.mxu1 %v3125_v33 }
 0x55b   :  { %2447 = vmatprep.subr.bf16.mxu0 %v3130_v62  ;;  %2479 = vmatprep.subr.bf16.mxu1 %v3132_v31 }
 0x55e   :  { %2449 = vmatpush1.bf16.msra.mxu0 %v3134_v32  ;;  %2481 = vmatpush1.bf16.msra.mxu1 %v3137_v47 }
 0x55f   :  { %2451 = vmatprep.subr.bf16.mxu0 %v3142_v29  ;;  %2483 = vmatprep.subr.bf16.mxu1 %v3144_v27 }
 0x562   :  { %2453 = vmatpush1.bf16.msra.mxu0 %v3081_v14  ;;  %2485 = vmatpush1.bf16.msra.mxu1 %v3146_v38  ;;  %v1256_v14 = vld [vmem:[#allocation4 + $0xa0] sm:$0xff] }
 0x563   :  { %2455 = vmatprep.subr.bf16.mxu0 %v3152_v7  ;;  %2487 = vmatprep.subr.bf16.mxu1 %v3154_v50 }
 0x566   :  { %2457 = vmatpush1.bf16.msra.mxu0 %v3085_v26  ;;  %2489 = vmatpush1.bf16.msra.mxu1 %v3156_v51  ;;  %v1257_v26 = vld [vmem:[#allocation4 + $0xa8] sm:$0xff] }
 0x567   :  { %2459 = vmatprep.subr.bf16.mxu0 %v3161_v57  ;;  %2491 = vmatprep.subr.bf16.mxu1 %v3164_v22 }
 0x56a   :  { %2461 = vmatpush1.bf16.msra.mxu0 %v3088_v37  ;;  %2493 = vmatpush1.bf16.msra.mxu1 %v3166_v63 }
 0x56b   :  { %2463 = vmatprep.subr.bf16.mxu0 %v3169_v13  ;;  %2495 = vmatprep.subr.bf16.mxu1 %v3172_v8 }
 0x56e   :  { %2465 = vmatpush1.bf16.msra.mxu0 %v3092_v52  ;;  %2497 = vmatpush1.bf16.msra.mxu1 %v3177_v46 }
 0x56f   :  { %2467 = vmatprep.subr.bf16.mxu0 %v3179_v15  ;;  %2499 = vmatprep.subr.bf16.mxu1 %v3182_v58 }
 0x572   :  { %2469 = vmatpush1.bf16.msra.mxu0 %v3096_v1  ;;  %2501 = vmatpush1.bf16.msra.mxu1 %v3187_v41 }
 0x573   :  { %2503 = vmatprep.subr.bf16.mxu0 %v3106_v4  ;;  %2535 = vmatprep.subr.bf16.mxu1 %v3108_v2 }
 0x628   :  { %v1390_v37 = vpop.f32.mrb[10].mxu0  ;;  %v1461_v45 = vpop.f32.mrb[10].mxu1 }
 0x629   :  { %v1466_v53 = vadd.f32 %v1390_v37, %v1256_v14  ;;  %v1392_v52 = vpop.f32.mrb[11].mxu0  ;;  %v1463_v23 = vpop.f32.mrb[11].mxu1  ;;  %v1468_v42 = vadd.f32 %v1461_v45, %v1258_v36  ;;  %v1739_v36 = vld [vmem:[#allocation4 + $0xe8] sm:$0xff] }
 0x62a   :  { %v1467_v10 = vadd.f32 %v1392_v52, %v1257_v26  ;;  %v1469_v1 = vadd.f32 %v1463_v23, %v1259_v35 }
 0x62b   :  { %v2045_v28 = vmul.f32 -1.442695, %v1466_v53 }
 0x62c   :  { %v2046_v34 = vmul.f32 -1.442695, %v1467_v10  ;;  %v2047_v43 = vmul.f32 -1.442695, %v1469_v1  ;;  %v1738_v1 = vld [vmem:[#allocation4 + $0xe0] sm:$0xff] }
 0x62d   :  { %2656 = vpow2.f32 %v2045_v28 }
 0x62e   :  { %2658 = vpow2.f32 %v2046_v34 }
 0x62f   :  { %2660 = vpow2.f32 %v2047_v43 }
 0x630   :  { %2662 = vtanh.f32 %v1468_v42 }
 0x637   :  { %v2657_v4 = vpop.eup %2656 }
 0x638   :  { %v2659_v55 = vpop.eup %2658  ;;  %v1473_v2 = vadd.f32 1.0, %v2657_v4 }
 0x639   :  { %v1479_v44 = vadd.f32 1.0, %v2659_v55  ;;  %v2661_v49 = vpop.eup %2660 }
 0x63a   :  { %2664 = vrcp.f32 %v1473_v2  ;;  %v2663_v24 = vpop.eup %2662  ;;  %v1486_v59 = vadd.f32 1.0, %v2661_v49 }
 0x63b   :  { %2666 = vrcp.f32 %v1479_v44 }
 0x63c   :  { %2668 = vrcp.f32 %v1486_v59 }
 0x644   :  { %v2665_v54 = vpop.eup %2664 }
 0x645   :  { %v2667_v56 = vpop.eup %2666  ;;  %v1490_v39 = vmul.f32 %v2665_v54, %v2663_v24  ;;  %v1741_v54 = vld [vmem:[#allocation4 + $0xf8] sm:$0xff] }
 0x646   :  { %v1489_v60 = vmul.f32 %v2667_v56, %v3233_v30  ;;  %v2669_v5 = vpop.eup %2668 }
 0x648   :  { %v3271_v61 = vadd.f32 %v1490_v39, %v1489_v60  ;;  %v1740_v39 = vld [vmem:[#allocation4 + $0xf0] sm:$0xff] }
 0x64a   :  { %2670 = vtanh.f32 %v3271_v61 }
 0x654   :  { %v2671_v6 = vpop.eup %2670 }
 0x655   :  { %v1493_v12 = vmul.f32 %v2671_v6, %v2669_v5 }
 0x657   :  { %1495 = vst [vmem:[#allocation9 + $0x28] sm:$0xff] %v1493_v12  ;;  %1630 = vmatmul.mubr.f32.vlgmr.msra.gmra.mrb[12].mxu0 %v1493_v12  ;;  %1701 = vmatmul.mubr.f32.vlgmr.msra.gmra.mrb[12].mxu1 %v1493_v12 }
 0x658   :  { %2505 = vmatpush1.bf16.msra.mxu0 %v3110_v3  ;;  %2537 = vmatpush1.bf16.msra.mxu1 %v3113_v11  ;;  %v1770_v3 = vld [vmem:[#allocation7 + $0xe0] sm:$0xff] }
 0x659   :  { %2507 = vmatprep.subr.bf16.mxu0 %v3118_v19  ;;  %2539 = vmatprep.subr.bf16.mxu1 %v3120_v9  ;;  %v1774_v19 = vld [vmem:[#allocation7 + $0x100] sm:$0xff] }
 0x65a   :  { %1870 = vmatprep.mubr.f32.mxu0 %v2826_v0  ;;  %1941 = vmatprep.mubr.f32.mxu1 %v2826_v0  ;;  %v1766_v0 = vld [vmem:[#allocation7 + $0xc0] sm:$0xff] }
 0x65b   :  { %v2516_v11 = vpack.c.bf16 %v1770_v3, %v1766_v0  ;;  %v1778_v9 = vld [vmem:[#allocation7 + $0x120] sm:$0xff] }
 0x65c   :  { %2509 = vmatpush1.bf16.msra.mxu0 %v3122_v17  ;;  %2541 = vmatpush1.bf16.msra.mxu1 %v3125_v33  ;;  %v2520_v17 = vpack.c.bf16 %v1778_v9, %v1774_v19  ;;  %v1782_v33 = vld [vmem:[#allocation7 + $0x140] sm:$0xff] }
 0x65d   :  { %2511 = vmatprep.subr.bf16.mxu0 %v3130_v62  ;;  %2543 = vmatprep.subr.bf16.mxu1 %v3132_v31  ;;  %v1786_v62 = vld [vmem:[#allocation7 + $0x160] sm:$0xff] }
 0x65e   :  { %v2524_v31 = vpack.c.bf16 %v1786_v62, %v1782_v33 }
 0x660   :  { %2513 = vmatpush1.bf16.msra.mxu0 %v3134_v32  ;;  %2545 = vmatpush1.bf16.msra.mxu1 %v3137_v47  ;;  %v1790_v32 = vld [vmem:[#allocation7 + $0x180] sm:$0xff] }
 0x661   :  { %2515 = vmatprep.subr.bf16.mxu0 %v3142_v29  ;;  %2547 = vmatprep.subr.bf16.mxu1 %v3144_v27  ;;  %v1794_v47 = vld [vmem:[#allocation7 + $0x1a0] sm:$0xff] }
 0x662   :  { %v2528_v29 = vpack.c.bf16 %v1794_v47, %v1790_v32  ;;  %v1798_v27 = vld [vmem:[#allocation7 + $0x1c0] sm:$0xff] }
 0x664   :  { %2549 = vmatpush1.bf16.msra.mxu1 %v3146_v38  ;;  %2517 = vmatpush1.bf16.msra.mxu0 %v2516_v11  ;;  %v1802_v38 = vld [vmem:[#allocation7 + $0x1e0] sm:$0xff] }
 0x665   :  { %2551 = vmatprep.subr.bf16.mxu1 %v3154_v50  ;;  %2519 = vmatprep.subr.bf16.mxu0 %v3152_v7  ;;  %v2532_v50 = vpack.c.bf16 %v1802_v38, %v1798_v27  ;;  %v1497_v7 = vld [vmem:[#allocation4 + $0xc0] sm:$0xff] }
 0x668   :  { %2553 = vmatpush1.bf16.msra.mxu1 %v3156_v51  ;;  %2521 = vmatpush1.bf16.msra.mxu0 %v2520_v17  ;;  %v1498_v51 = vld [vmem:[#allocation4 + $0xc8] sm:$0xff] }
 0x669   :  { %2555 = vmatprep.subr.bf16.mxu1 %v3164_v22  ;;  %2523 = vmatprep.subr.bf16.mxu0 %v3161_v57 }
 0x66c   :  { %2557 = vmatpush1.bf16.msra.mxu1 %v3166_v63  ;;  %2525 = vmatpush1.bf16.msra.mxu0 %v2524_v31 }
 0x66d   :  { %2559 = vmatprep.subr.bf16.mxu1 %v3172_v8  ;;  %2527 = vmatprep.subr.bf16.mxu0 %v3169_v13 }
 0x670   :  { %2561 = vmatpush1.bf16.msra.mxu1 %v3177_v46  ;;  %2529 = vmatpush1.bf16.msra.mxu0 %v2528_v29 }
 0x671   :  { %2563 = vmatprep.subr.bf16.mxu1 %v3182_v58  ;;  %2531 = vmatprep.subr.bf16.mxu0 %v3179_v15 }
 0x674   :  { %2565 = vmatpush1.bf16.msra.mxu1 %v3187_v41  ;;  %2533 = vmatpush1.bf16.msra.mxu0 %v2532_v50 }
 0x72a   :  { %v1631_v22 = vpop.f32.mrb[12].mxu0  ;;  %v1702_v63 = vpop.f32.mrb[12].mxu1 }
 0x72b   :  { %v1707_v8 = vadd.f32 %v1631_v22, %v1497_v7  ;;  %v1633_v46 = vpop.f32.mrb[13].mxu0  ;;  %v1704_v57 = vpop.f32.mrb[13].mxu1  ;;  %v1709_v30 = vadd.f32 %v1702_v63, %v1499_v21 }
 0x72c   :  { %v1708_v58 = vadd.f32 %v1633_v46, %v1498_v51  ;;  %v1710_v13 = vadd.f32 %v1704_v57, %v1500_v20 }
 0x72d   :  { %v2048_v41 = vmul.f32 -1.442695, %v1707_v8 }
 0x72e   :  { %v2049_v16 = vmul.f32 -1.442695, %v1708_v58  ;;  %v2050_v25 = vmul.f32 -1.442695, %v1710_v13 }
 0x72f   :  { %2672 = vpow2.f32 %v2048_v41 }
 0x730   :  { %2674 = vpow2.f32 %v2049_v16 }
 0x731   :  { %2676 = vpow2.f32 %v2050_v25 }
 0x732   :  { %2678 = vtanh.f32 %v1709_v30 }
 0x739   :  { %v2673_v48 = vpop.eup %2672 }
 0x73a   :  { %v2675_v15 = vpop.eup %2674  ;;  %v1714_v18 = vadd.f32 1.0, %v2673_v48 }
 0x73b   :  { %v1720_v40 = vadd.f32 1.0, %v2675_v15  ;;  %v2677_v14 = vpop.eup %2676 }
 0x73c   :  { %2680 = vrcp.f32 %v1714_v18  ;;  %v2679_v26 = vpop.eup %2678  ;;  %v1727_v52 = vadd.f32 1.0, %v2677_v14 }
 0x73d   :  { %2682 = vrcp.f32 %v1720_v40 }
 0x73e   :  { %2684 = vrcp.f32 %v1727_v52 }
 0x746   :  { %v2681_v37 = vpop.eup %2680 }
 0x747   :  { %v2683_v45 = vpop.eup %2682  ;;  %v1731_v53 = vmul.f32 %v2681_v37, %v2679_v26 }
 0x748   :  { %v1730_v23 = vmul.f32 %v2683_v45, %v3271_v61  ;;  %v2685_v28 = vpop.eup %2684 }
 0x74a   :  { %v1732_v10 = vadd.f32 %v1731_v53, %v1730_v23 }
 0x74c   :  { %2686 = vtanh.f32 %v1732_v10 }
 0x756   :  { %v2687_v34 = vpop.eup %2686 }
 0x757   :  { %v1734_v35 = vmul.f32 %v2687_v34, %v2685_v28 }
 0x759   :  { %1736 = vst [vmem:[#allocation9 + $0x30] sm:$0xff] %v1734_v35  ;;  %1871 = vmatmul.mubr.f32.vlgmr.msra.gmra.mrb[14].mxu0 %v1734_v35  ;;  %1942 = vmatmul.mubr.f32.vlgmr.msra.gmra.mrb[14].mxu1 %v1734_v35 }
 0x82c   :  { %v1872_v43 = vpop.f32.mrb[14].mxu0  ;;  %v1943_v42 = vpop.f32.mrb[14].mxu1 }
 0x82d   :  { %v1948_v4 = vadd.f32 %v1872_v43, %v1738_v1  ;;  %v1874_v55 = vpop.f32.mrb[15].mxu0  ;;  %v1945_v2 = vpop.f32.mrb[15].mxu1  ;;  %v1950_v60 = vadd.f32 %v1943_v42, %v1740_v39 }
 0x82e   :  { %v1949_v44 = vadd.f32 %v1874_v55, %v1739_v36  ;;  %v1951_v56 = vadd.f32 %v1945_v2, %v1741_v54 }
 0x82f   :  { %v2051_v49 = vmul.f32 -1.442695, %v1948_v4 }
 0x830   :  { %v2052_v24 = vmul.f32 -1.442695, %v1949_v44  ;;  %v2053_v59 = vmul.f32 -1.442695, %v1951_v56 }
 0x831   :  { %2688 = vpow2.f32 %v2051_v49 }
 0x832   :  { %2690 = vpow2.f32 %v2052_v24 }
 0x833   :  { %2692 = vpow2.f32 %v2053_v59 }
 0x834   :  { %2694 = vtanh.f32 %v1950_v60 }
 0x83b   :  { %v2689_v61 = vpop.eup %2688 }
 0x83c   :  { %v2691_v5 = vpop.eup %2690  ;;  %v1955_v6 = vadd.f32 1.0, %v2689_v61 }
 0x83d   :  { %v1961_v12 = vadd.f32 1.0, %v2691_v5  ;;  %v2693_v0 = vpop.eup %2692 }
 0x83e   :  { %2696 = vrcp.f32 %v1955_v6  ;;  %v2695_v3 = vpop.eup %2694  ;;  %v1968_v17 = vadd.f32 1.0, %v2693_v0 }
 0x83f   :  { %2698 = vrcp.f32 %v1961_v12 }
 0x840   :  { %2700 = vrcp.f32 %v1968_v17 }
 0x848   :  { %v2697_v11 = vpop.eup %2696 }
 0x849   :  { %v2699_v19 = vpop.eup %2698  ;;  %v1972_v9 = vmul.f32 %v2697_v11, %v2695_v3 }
 0x84a   :  { %v1971_v33 = vmul.f32 %v2699_v19, %v1732_v10  ;;  %v2701_v31 = vpop.eup %2700 }
 0x84c   :  { %v1973_v62 = vadd.f32 %v1972_v9, %v1971_v33 }
 0x84e   :  { %2702 = vtanh.f32 %v1973_v62  ;;  %1984 = vst [vmem:[#allocation12] sm:$0xff] %v1973_v62 }
 0x858   :  { %v2703_v32 = vpop.eup %2702 }
 0x859   :  { %v1975_v47 = vmul.f32 %v2703_v32, %v2701_v31 }
 0x85b   :  { %1977 = vst [vmem:[#allocation9 + $0x38] sm:$0xff] %v1975_v47  ;;  %1983 = vst [vmem:[#allocation10] sm:$0xff] %v1975_v47 }
 0x85c   :  { %2759 = shalt.err (!%p2756_p6)
}
 0x85d   :  { %s2760_s22 = scalar_lea.hbm %s3355_s3, 128 }
 0x85e   :  { %p2761_p7 = scmp.ne.s32.totalorder %s3355_s3, %s2760_s22  ;;  %p2764_p8 = scmp.lt.u32.totalorder %s2760_s22, %s3355_s3 }
 0x860   :  { %p2766_p9 = pnand %p2764_p8, %p2761_p7 }
 0x862   :  { %2769 = shalt.err (!%p2766_p9)
}
 0x863   :  { %2006 = dma.vmem_to_hbm [thread:$0]  %s2004_s14, 128, %s3355_s3, [#allocation11]  }
 0x864   :  { %s2770_s29 = scalar_lea.vmem %s3302_s16, 1024  ;;  %p2775_p11 = scmp.lt.s32.totalorder %s3302_s16, %s3302_s16 }
 0x865   :  { %p2771_p10 = scmp.ne.s32.totalorder %s3302_s16, %s2770_s29  ;;  %p2776_p12 = scmp.lt.s32.totalorder %s2770_s29, %s2770_s29 }
 0x867   :  { %p2777_p13 = por %p2776_p12, %p2775_p11 }
 0x869   :  { %p2778_p0 = pnand %p2777_p13, %p2771_p10 }
 0x86b   :  { %2781 = shalt.err (!%p2778_p0)
}
 0x86c   :  { %s2782_s6 = scalar_lea.hbm %s3354_s2, 1024 }
 0x86d   :  { %p2783_p1 = scmp.ne.s32.totalorder %s3354_s2, %s2782_s6  ;;  %p2786_p2 = scmp.lt.u32.totalorder %s2782_s6, %s3354_s2 }
 0x86f   :  { %p2788_p3 = pnand %p2786_p2, %p2783_p1 }
 0x871   :  { %2791 = shalt.err (!%p2788_p3)
}
 0x872   :  { %s2830_s3 = smov 128   ;;  %s2831_s11 = smov 8  }
 0x873   :  { %1996 = dma.vmem_to_hbm [thread:$0]  %s3302_s16, 1024, %s3354_s2, [#allocation6], %s2830_s3, %s2830_s3, %s2831_s11  }
 0x874   :  { %s2792_s13 = scalar_lea.vmem %s3304_s18, 128  ;;  %p2797_p5 = scmp.lt.s32.totalorder %s3304_s18, %s3304_s18 }
 0x875   :  { %p2793_p4 = scmp.ne.s32.totalorder %s3304_s18, %s2792_s13  ;;  %p2798_p6 = scmp.lt.s32.totalorder %s2792_s13, %s2792_s13 }
 0x877   :  { %p2799_p7 = por %p2798_p6, %p2797_p5 }
 0x879   :  { %p2800_p8 = pnand %p2799_p7, %p2793_p4 }
 0x87b   :  { %2803 = shalt.err (!%p2800_p8)
}
 0x87c   :  { %s2804_s15 = scalar_lea.hbm %s3356_s4, 128 }
 0x87d   :  { %p2805_p9 = scmp.ne.s32.totalorder %s3356_s4, %s2804_s15  ;;  %p2808_p10 = scmp.lt.u32.totalorder %s2804_s15, %s3356_s4 }
 0x87f   :  { %p2810_p11 = pnand %p2808_p10, %p2805_p9 }
 0x881   :  { %2813 = shalt.err (!%p2810_p11)
}
 0x882   :  { %2016 = dma.vmem_to_hbm [thread:$0]  %s3304_s18, 128, %s3356_s4, [#allocation11]  }
 0x883   :  { %2818 = dma.done.wait [#allocation6], 1024  }
 0x884   :  { %2819 = vsyncadd [#allocation6], 4294966272 }
 0x885   :  { %2820 = dma.done.wait [#allocation11], 256  }
 0x886   :  { %2821 = vsyncadd [#allocation11], 4294967040 }
 0x887   :  { %2026 = vsyncpa [#allocation5], 1 }
 0x888   :  { %2027 = vsyncpa [#allocation8], 1 }
 0x889   :  { %2028 = vsyncpa [#allocation6], 1 }
 0x88a   :  { %2029 = vsyncpa [#allocation11], 1 }

</bundles_post_ra>
